<compile_context>
chip_gen: v6e
topology: v6e:2x2x1
jax: 0.10.0
libtpu: 0.0.40
codegen_flags: <defaults>
</compile_context>

<pallas_src>
import functools
import math

import jax
import jax.numpy as jnp
from jax import lax
from jax.experimental import pallas as pl
from jax.experimental.pallas import tpu as pltpu

LANES = 128   # vreg lane width; conv activation lanes are zero-padded to this
OUT_W = 128   # packed output row: [mu | pi | log_std | log_pi | 0-pad]


def _tree_sum(xs):
    """Pairwise (tree) sum so independent MXU partials pipeline instead of chaining."""
    xs = list(xs)
    while len(xs) > 1:
        nxt = [xs[i] + xs[i + 1] for i in range(0, len(xs) - 1, 2)]
        if len(xs) % 2:
            nxt.append(xs[-1])
        xs = nxt
    return xs[0]


# ---------------------------------------------------------------------------
# Fused Actor kernel (one grid step == Bt batch elements)
# ---------------------------------------------------------------------------

def _actor_fused_kernel(p1_ref, noise_ref, w1_ref, w2_ref, wfc_ref, wmlp_ref,
                        vecs_ref, out_ref, *, bt, oh2, feature_dim, hidden_dim,
                        action_dim, log_std_min, log_std_max):
    f32 = jnp.float32
    A = action_dim

    # ---- packed small-vector params (one DMA for all biases / LN affine) ----
    b1 = vecs_ref[0:1, :]                          # conv1 bias per lane (1, 128)
    b2 = vecs_ref[1:2, :]                          # conv2 bias per lane (1, 128)
    bfc = vecs_ref[2:3, 0:feature_dim]             # encoder fc bias
    ln_g = vecs_ref[3:4, 0:feature_dim]            # LayerNorm gamma
    ln_b = vecs_ref[4:5, 0:feature_dim]            # LayerNorm beta
    bt1 = vecs_ref[5:6, 0:hidden_dim]              # trunk fc1 bias
    bt2 = vecs_ref[6:7, 0:hidden_dim]              # trunk fc2 bias
    bhd = vecs_ref[7:8, 0:2 * A]                   # head bias [mu | log_std]

    # ---- conv1 (3x3 stride 2): ONE matmul for the whole Bt-sample tile ------
    # p1 rows ordered (conv row r, sample s); lanes (width col c, filter f),
    # zero-padded to 128.  obs/255 is folded into w1.
    y1 = jnp.dot(p1_ref[...], w1_ref[...], preferred_element_type=f32)
    y1 = jnp.maximum(y1 + b1, 0.0)                 # (OH1*Bt, 128)

    # ---- conv2 (3x3 stride 1): 9 independent tap matmuls, tree-summed -------
    # Row offset i is a sublane-tile-aligned slice (i*Bt, Bt==8); column offset
    # j is folded into the per-tap block-diagonal weights (full-lane LHS).
    n_out = oh2 * bt
    parts = []
    for t in range(9):
        i = t // 3
        lhs = y1[i * bt:i * bt + n_out, :]         # (OH2*Bt, 128), 8-aligned slice
        parts.append(jnp.dot(lhs, w2_ref[t], preferred_element_type=f32))
    a = jnp.maximum(_tree_sum(parts) + b2, 0.0)    # (OH2*Bt, 128)

    # ---- encoder fc: OH2 independent batched matmuls, tree-summed -----------
    fparts = [jnp.dot(a[r * bt:(r + 1) * bt, :], wfc_ref[r],
                      preferred_element_type=f32) for r in range(oh2)]
    feat = _tree_sum(fparts) + bfc                 # (Bt, feature_dim)

    # ---- LayerNorm (biased var, eps 1e-5); output_logits=True => no tanh ----
    mean = jnp.mean(feat, axis=-1, keepdims=True)
    cent = feat - mean
    var = jnp.mean(cent * cent, axis=-1, keepdims=True)
    feat = cent * lax.rsqrt(var + 1e-5) * ln_g + ln_b

    # ---- trunk MLP + head, batched over the Bt samples (M = Bt) -------------
    h = jnp.maximum(jnp.dot(feat, wmlp_ref[0], preferred_element_type=f32) + bt1, 0.0)
    h = jnp.maximum(jnp.dot(h, wmlp_ref[1], preferred_element_type=f32) + bt2, 0.0)
    o = jnp.dot(h, wmlp_ref[2], preferred_element_type=f32)[:, 0:2 * A] + bhd
    mu = o[:, 0:A]
    ls = o[:, A:2 * A]

    # constrain log_std inside [log_std_min, log_std_max]
    log_std = jnp.tanh(ls)
    log_std = log_std_min + 0.5 * (log_std_max - log_std_min) * (log_std + 1.0)

    std = jnp.exp(log_std)
    noise = noise_ref[...]                         # (Bt, A)
    pi = mu + noise * std

    # gaussian_logprob
    log_pi = jnp.sum(-0.5 * noise * noise - log_std, axis=-1, keepdims=True)
    log_pi = log_pi - 0.5 * math.log(2.0 * math.pi) * A

    # squash
    mu_t = jnp.tanh(mu)
    pi_t = jnp.tanh(pi)
    log_pi = log_pi - jnp.sum(
        jnp.log(jnp.maximum(1.0 - pi_t * pi_t, 0.0) + 1e-6), axis=-1, keepdims=True)

    # ---- single lane-dense 128-wide store: [mu | pi | log_std | log_pi | pad]
    pad = jnp.zeros((bt, OUT_W - (3 * A + 1)), f32)
    out_ref[...] = jnp.concatenate([mu_t, pi_t, log_std, log_pi, pad], axis=-1)


# ---------------------------------------------------------------------------
# Parameter construction (weight_init semantics), in kernel layouts
# ---------------------------------------------------------------------------

def orthogonal(key, shape, gain=1.0):
    """(Semi-)orthogonal init matching nn.init.orthogonal_; shape = (out, in)."""
    n_rows, n_cols = shape
    flat = jax.random.normal(key, (max(n_rows, n_cols), min(n_rows, n_cols)), jnp.float32)
    q, r = jnp.linalg.qr(flat)
    q = q * jnp.sign(jnp.diagonal(r))
    if n_rows < n_cols:
        q = q.T
    return (gain * q[:n_rows, :n_cols]).astype(jnp.float32)


def make_params(key, obs_shape, action_dim, hidden_dim, feature_dim, num_filters):
    """Returns (kernel_layout_params, torch_layout_params)."""
    C, H, W = obs_shape
    OH1 = (H - 3) // 2 + 1
    OW1 = (W - 3) // 2 + 1
    OH2, OW2 = OH1 - 2, OW1 - 2
    F = num_filters
    A = action_dim
    f32 = jnp.float32

    assert OW1 * F <= LANES and OW2 * F <= LANES, "conv width*filters must fit 128 lanes"
    assert feature_dim == hidden_dim, "weight-slab packing assumes feature_dim == hidden_dim"
    assert 2 * A <= hidden_dim, "fused head slab assumes 2*action_dim <= hidden_dim"

    relu_gain = math.sqrt(2.0)
    ks = jax.random.split(key, 6)

    def conv_weight(k, o, i):
        # weight_init: conv weight zero except center tap orthogonal(relu gain)
        w = jnp.zeros((o, i, 3, 3), f32)
        return w.at[:, :, 1, 1].set(orthogonal(k, (o, i), gain=relu_gain))

    w1_t = conv_weight(ks[0], F, C)                         # (F, C, 3, 3)
    w2_t = conv_weight(ks[1], F, F)                         # (F, F, 3, 3)
    fc_t = orthogonal(ks[2], (feature_dim, F * OH2 * OW2))  # torch flatten = (f, r, c)
    t1_t = orthogonal(ks[3], (hidden_dim, feature_dim))
    t2_t = orthogonal(ks[4], (hidden_dim, hidden_dim))
    t3_t = orthogonal(ks[5], (2 * A, hidden_dim))

    torch_params = dict(
        w1=w1_t, b1=jnp.zeros((F,), f32),
        w2=w2_t, b2=jnp.zeros((F,), f32),
        fc=fc_t, b_fc=jnp.zeros((feature_dim,), f32),
        ln_g=jnp.ones((feature_dim,), f32), ln_b=jnp.zeros((feature_dim,), f32),
        t1=t1_t, b_t1=jnp.zeros((hidden_dim,), f32),
        t2=t2_t, b_t2=jnp.zeros((hidden_dim,), f32),
        t3=t3_t, b_t3=jnp.zeros((2 * A,), f32),
    )

    # --- kernel layouts ------------------------------------------------------
    # conv1: block-diagonal over the OW1 output columns; obs/255 folded in;
    # output lanes (col c, filter f) zero-padded to 128.
    w1_mat = jnp.transpose(w1_t, (2, 3, 1, 0)).reshape(9 * C, F) / 255.0  # rows (i,j,ch)
    w1 = jnp.zeros((OW1 * 9 * C, LANES), f32)
    for c in range(OW1):
        w1 = w1.at[c * 9 * C:(c + 1) * 9 * C, c * F:(c + 1) * F].set(w1_mat)

    # conv2: per-tap (i,j) weight with the column shift j folded in:
    # input lane (c+j)*F + f_in  ->  output lane c*F + f_out.
    w2_taps = jnp.transpose(w2_t, (2, 3, 1, 0))             # (i, j, f_in, f_out)
    w2 = jnp.zeros((9, LANES, LANES), f32)
    for i in range(3):
        for j in range(3):
            for c in range(OW2):
                w2 = w2.at[i * 3 + j,
                           (c + j) * F:(c + j + 1) * F,
                           c * F:(c + 1) * F].set(w2_taps[i, j])

    # encoder fc, regrouped from torch's (f, r, c) flatten into per-conv-row
    # slabs over lanes (c*F + f):  wfc[r, c*F+f, k] = fc_t[k, (f*OH2 + r)*OW2 + c]
    fc_r = jnp.transpose(fc_t.reshape(feature_dim, F, OH2, OW2), (2, 3, 1, 0))
    wfc = jnp.zeros((OH2, LANES, feature_dim), f32)
    wfc = wfc.at[:, :OW2 * F, :].set(fc_r.reshape(OH2, OW2 * F, feature_dim))

    # trunk + head weights fused into one (3, hidden, hidden) slab
    wmlp = jnp.zeros((3, hidden_dim, hidden_dim), f32)
    wmlp = wmlp.at[0].set(t1_t.T)
    wmlp = wmlp.at[1].set(t2_t.T)
    wmlp = wmlp.at[2, :, :2 * A].set(t3_t.T)

    # all bias / LayerNorm vectors packed into one lane-dense (8, 128) buffer
    vecs = jnp.zeros((8, LANES), f32)
    vecs = vecs.at[0, :OW1 * F].set(jnp.tile(torch_params['b1'], OW1))
    vecs = vecs.at[1, :OW2 * F].set(jnp.tile(torch_params['b2'], OW2))
    vecs = vecs.at[2, :feature_dim].set(torch_params['b_fc'])
    vecs = vecs.at[3, :feature_dim].set(torch_params['ln_g'])
    vecs = vecs.at[4, :feature_dim].set(torch_params['ln_b'])
    vecs = vecs.at[5, :hidden_dim].set(torch_params['b_t1'])
    vecs = vecs.at[6, :hidden_dim].set(torch_params['b_t2'])
    vecs = vecs.at[7, :2 * A].set(torch_params['b_t3'])

    kernel_params = dict(w1=w1, w2=w2, wfc=wfc, wmlp=wmlp, vecs=vecs)
    return kernel_params, torch_params


# ---------------------------------------------------------------------------
# Actor forward (compute_pi=True, compute_log_pi=True; detach_encoder only
# affects gradients, not forward values)
# ---------------------------------------------------------------------------

def actor_forward(obs, noise, params, *, action_dim, num_filters, batch_tile=8,
                  log_std_min=-10.0, log_std_max=2.0):
    B, C, H, W = obs.shape
    OH1 = (H - 3) // 2 + 1
    OW1 = (W - 3) // 2 + 1
    OH2 = OH1 - 2
    A = action_dim
    Bt = batch_tile
    K1 = OW1 * 9 * C
    feature_dim = params['wfc'].shape[-1]
    hidden_dim = params['wmlp'].shape[-1]

    assert 3 * A + 1 <= OUT_W, "packed output row would overflow 128 lanes"
    assert B % Bt == 0, "batch must be a multiple of the batch tile"
    G = B // Bt

    # conv1 im2col patch rows (channels-last, tap-major per output pixel).
    # obs/255 is folded into the conv1 weights so no wrapper-side scaling op.
    # TODO(synk): this last wrapper-side gather could also move in-kernel with
    # strided pl.ds loads on a channels-last obs block (v5e HBM-traffic item).
    x = jnp.transpose(obs.astype(jnp.float32), (0, 2, 3, 1))          # (B, H, W, C)
    taps = [x[:, i:i + 2 * OH1:2, j:j + 2 * OW1:2, :]
            for i in range(3) for j in range(3)]
    p1 = jnp.stack(taps, axis=3).reshape(B, OH1, K1)
    # Re-order rows to (tile g, conv row r, sample s) so the conv matmuls run
    # with M = Bt*rows and all tap slices are sublane-tile (8) aligned (Bt=8).
    p1 = p1.reshape(G, Bt, OH1, K1).transpose(0, 2, 1, 3).reshape(G, OH1 * Bt, K1)

    kernel = functools.partial(
        _actor_fused_kernel, bt=Bt, oh2=OH2, feature_dim=feature_dim,
        hidden_dim=hidden_dim, action_dim=A,
        log_std_min=float(log_std_min), log_std_max=float(log_std_max))

    def const_spec(shape):
        nz = (0,) * len(shape)
        return pl.BlockSpec(tuple(shape), lambda g: nz)

    grid_spec = pltpu.PrefetchScalarGridSpec(
        num_scalar_prefetch=0,
        grid=(G,),
        in_specs=[
            pl.BlockSpec((None, OH1 * Bt, K1), lambda g: (g, 0, 0)),  # p1 tile
            pl.BlockSpec((Bt, A), lambda g: (g, 0)),                  # noise tile
            const_spec(params['w1'].shape),
            const_spec(params['w2'].shape),
            const_spec(params['wfc'].shape),
            const_spec(params['wmlp'].shape),
            const_spec(params['vecs'].shape),
        ],
        out_specs=pl.BlockSpec((Bt, OUT_W), lambda g: (g, 0)),
    )

    packed = pl.pallas_call(
        kernel,
        out_shape=jax.ShapeDtypeStruct((B, OUT_W), jnp.float32),
        grid_spec=grid_spec,
        compiler_params=pltpu.CompilerParams(
            dimension_semantics=("parallel",),
            vmem_limit_bytes=32 * 1024 * 1024),
    )(p1, noise, params['w1'], params['w2'], params['wfc'],
      params['wmlp'], params['vecs'])

    mu = packed[:, 0:A]
    pi = packed[:, A:2 * A]
    log_std = packed[:, 2 * A:3 * A]
    log_pi = packed[:, 3 * A:3 * A + 1]
    return mu, pi, log_pi, log_std


# ---------------------------------------------------------------------------
# Pure-JAX reference of the same forward (torch-layout params)
# ---------------------------------------------------------------------------

def reference_forward(obs, noise, tp, *, log_std_min, log_std_max):
    B = obs.shape[0]
    A = tp['t3'].shape[0] // 2
    dn = ('NCHW', 'OIHW', 'NCHW')
    x = obs.astype(jnp.float32) / 255.0
    y = lax.conv_general_dilated(x, tp['w1'], (2, 2), 'VALID', dimension_numbers=dn)
    y = jnp.maximum(y + tp['b1'][None, :, None, None], 0.0)
    y = lax.conv_general_dilated(y, tp['w2'], (1, 1), 'VALID', dimension_numbers=dn)
    y = jnp.maximum(y + tp['b2'][None, :, None, None], 0.0)
    feat = y.reshape(B, -1) @ tp['fc'].T + tp['b_fc']
    mean = feat.mean(-1, keepdims=True)
    var = ((feat - mean) ** 2).mean(-1, keepdims=True)
    feat = (feat - mean) * lax.rsqrt(var + 1e-5) * tp['ln_g'] + tp['ln_b']
    h = jnp.maximum(feat @ tp['t1'].T + tp['b_t1'], 0.0)
    h = jnp.maximum(h @ tp['t2'].T + tp['b_t2'], 0.0)
    o = h @ tp['t3'].T + tp['b_t3']
    mu, ls = o[:, :A], o[:, A:]
    log_std = jnp.tanh(ls)
    log_std = log_std_min + 0.5 * (log_std_max - log_std_min) * (log_std + 1.0)
    pi = mu + noise * jnp.exp(log_std)
    log_pi = jnp.sum(-0.5 * noise * noise - log_std, axis=-1, keepdims=True) \
        - 0.5 * math.log(2.0 * math.pi) * A
    mu, pi = jnp.tanh(mu), jnp.tanh(pi)
    log_pi = log_pi - jnp.sum(
        jnp.log(jnp.maximum(1.0 - pi * pi, 0.0) + 1e-6), axis=-1, keepdims=True)
    return mu, pi, log_pi, log_std


# ---------------------------------------------------------------------------
# Main
# ---------------------------------------------------------------------------

if __name__ == "__main__":
    key = jax.random.PRNGKey(0)
    k_param, k_obs, k_noise = jax.random.split(key, 3)

    # Small, shape-consistent config.
    B = 16                      # batch; grid = 2 tiles of Bt=8 (both v7x cores busy)
    Bt = 8                      # samples per grid step (batch tile)
    obs_shape = (3, 21, 21)     # (C, H, W), NCHW input like the torch module
    action_dim = 4
    hidden_dim = 32
    encoder_feature_dim = 32
    num_filters = 8
    log_std_min, log_std_max = -10.0, 2.0

    params, torch_params = make_params(k_param, obs_shape, action_dim, hidden_dim,
                                       encoder_feature_dim, num_filters)

    obs = jax.random.uniform(k_obs, (B,) + obs_shape, jnp.float32, 0.0, 255.0)
    # TODO(synk): torch.randn_like uses torch's global RNG; here the reparam
    # noise is drawn deterministically with JAX and passed into the kernel.
    noise = jax.random.normal(k_noise, (B, action_dim), jnp.float32)

    fwd = jax.jit(functools.partial(
        actor_forward, action_dim=action_dim, num_filters=num_filters,
        batch_tile=Bt, log_std_min=log_std_min, log_std_max=log_std_max))

    mu, pi, log_pi, log_std = fwd(obs, noise, params)
    jax.block_until_ready((mu, pi, log_pi, log_std))

    assert mu.shape == (B, action_dim)
    assert pi.shape == (B, action_dim)
    assert log_pi.shape == (B, 1)
    assert log_std.shape == (B, action_dim)

    # Reference check (loose tolerances: the kernel and XLA may use different
    # MXU precision modes for f32 matmuls; a layout bug would be O(1) off).
    with jax.default_matmul_precision("highest"):
        r_mu, r_pi, r_log_pi, r_log_std = reference_forward(
            obs, noise, torch_params,
            log_std_min=log_std_min, log_std_max=log_std_max)
    for got, want, tol in ((mu, r_mu, 5e-2), (pi, r_pi, 2e-1),
                           (log_std, r_log_std, 2e-1), (log_pi, r_log_pi, 5e-1)):
        assert bool(jnp.all(jnp.isfinite(got)))
        assert float(jnp.max(jnp.abs(got - want))) < tol

    print("KERNEL_OK")
</pallas_src>

<mosaic_0001>
module attributes {stable_mosaic.version = 11 : i64} {
  func.func @_actor_fused_kernel(%arg0: i32, %arg1: memref<1x80x270xf32, #tpu.memory_space<vmem>>, %arg2: memref<8x4xf32, #tpu.memory_space<vmem>>, %arg3: memref<270x128xf32, #tpu.memory_space<vmem>>, %arg4: memref<9x128x128xf32, #tpu.memory_space<vmem>>, %arg5: memref<8x128x32xf32, #tpu.memory_space<vmem>>, %arg6: memref<3x32x32xf32, #tpu.memory_space<vmem>>, %arg7: memref<8x128xf32, #tpu.memory_space<vmem>>, %arg8: memref<8x128xf32, #tpu.memory_space<vmem>>) attributes {dimension_semantics = [#tpu.dimension_semantics<parallel>], iteration_bounds = array<i64: 2>, scalar_prefetch = 0 : i64, scratch_operands = 0 : i64, tpu.core_type = #tpu.core_type<tc>, window_params = [{transform_indices = @transform_0, window_bounds = array<i64: 1, 80, 270>}, {transform_indices = @transform_1, window_bounds = array<i64: 8, 4>}, {pipeline_mode = #tpu.pipeline_mode<synchronous>, transform_indices = @transform_2, window_bounds = array<i64: 270, 128>}, {pipeline_mode = #tpu.pipeline_mode<synchronous>, transform_indices = @transform_3, window_bounds = array<i64: 9, 128, 128>}, {pipeline_mode = #tpu.pipeline_mode<synchronous>, transform_indices = @transform_4, window_bounds = array<i64: 8, 128, 32>}, {pipeline_mode = #tpu.pipeline_mode<synchronous>, transform_indices = @transform_5, window_bounds = array<i64: 3, 32, 32>}, {pipeline_mode = #tpu.pipeline_mode<synchronous>, transform_indices = @transform_6, window_bounds = array<i64: 8, 128>}, {transform_indices = @transform_7, window_bounds = array<i64: 8, 128>}]} {
    %c0 = arith.constant 0 : index
    %c0_0 = arith.constant 0 : index
    %0 = vector.load %arg7[%c0, %c0_0] : memref<8x128xf32, #tpu.memory_space<vmem>>, vector<1x128xf32>
    %c1 = arith.constant 1 : index
    %c0_1 = arith.constant 0 : index
    %1 = vector.load %arg7[%c1, %c0_1] : memref<8x128xf32, #tpu.memory_space<vmem>>, vector<1x128xf32>
    %c2 = arith.constant 2 : index
    %c0_2 = arith.constant 0 : index
    %2 = vector.load %arg7[%c2, %c0_2] : memref<8x128xf32, #tpu.memory_space<vmem>>, vector<1x32xf32>
    %c3 = arith.constant 3 : index
    %c0_3 = arith.constant 0 : index
    %3 = vector.load %arg7[%c3, %c0_3] : memref<8x128xf32, #tpu.memory_space<vmem>>, vector<1x32xf32>
    %c4 = arith.constant 4 : index
    %c0_4 = arith.constant 0 : index
    %4 = vector.load %arg7[%c4, %c0_4] : memref<8x128xf32, #tpu.memory_space<vmem>>, vector<1x32xf32>
    %c5 = arith.constant 5 : index
    %c0_5 = arith.constant 0 : index
    %5 = vector.load %arg7[%c5, %c0_5] : memref<8x128xf32, #tpu.memory_space<vmem>>, vector<1x32xf32>
    %c6 = arith.constant 6 : index
    %c0_6 = arith.constant 0 : index
    %6 = vector.load %arg7[%c6, %c0_6] : memref<8x128xf32, #tpu.memory_space<vmem>>, vector<1x32xf32>
    %c7 = arith.constant 7 : index
    %c0_7 = arith.constant 0 : index
    %7 = vector.load %arg7[%c7, %c0_7] : memref<8x128xf32, #tpu.memory_space<vmem>>, vector<1x8xf32>
    %c0_8 = arith.constant 0 : index
    %c0_9 = arith.constant 0 : index
    %c0_10 = arith.constant 0 : index
    %8 = vector.load %arg1[%c0_8, %c0_9, %c0_10] : memref<1x80x270xf32, #tpu.memory_space<vmem>>, vector<1x80x270xf32>
    %9 = vector.shape_cast %8 : vector<1x80x270xf32> to vector<80x270xf32>
    %c0_11 = arith.constant 0 : index
    %c0_12 = arith.constant 0 : index
    %10 = vector.load %arg3[%c0_11, %c0_12] : memref<270x128xf32, #tpu.memory_space<vmem>>, vector<270x128xf32>
    %cst = arith.constant dense<0.000000e+00> : vector<80x128xf32>
    %11 = tpu.matmul %9, %10, %cst {dimension_numbers = #tpu.dot_dimension_numbers<[1], [0], [0], [1], [0, 0, 1, 1], [], []>} : vector<80x270xf32>, vector<270x128xf32>, vector<80x128xf32> -> vector<80x128xf32>
    %12 = vector.broadcast %0 : vector<1x128xf32> to vector<80x128xf32>
    %13 = arith.addf %11, %12 : vector<80x128xf32>
    %cst_13 = arith.constant 0.000000e+00 : f32
    %14 = vector.broadcast %cst_13 : f32 to vector<80x128xf32>
    %15 = arith.maximumf %13, %14 : vector<80x128xf32>
    %16 = vector.extract_strided_slice %15 {offsets = [0, 0], sizes = [64, 128], strides = [1, 1]} : vector<80x128xf32> to vector<64x128xf32>
    %c0_14 = arith.constant 0 : index
    %c0_15 = arith.constant 0 : index
    %c0_16 = arith.constant 0 : index
    %17 = vector.load %arg4[%c0_14, %c0_15, %c0_16] : memref<9x128x128xf32, #tpu.memory_space<vmem>>, vector<1x128x128xf32>
    %18 = vector.shape_cast %17 : vector<1x128x128xf32> to vector<128x128xf32>
    %cst_17 = arith.constant dense<0.000000e+00> : vector<64x128xf32>
    %19 = tpu.matmul %16, %18, %cst_17 {dimension_numbers = #tpu.dot_dimension_numbers<[1], [0], [0], [1], [0, 0, 1, 1], [], []>} : vector<64x128xf32>, vector<128x128xf32>, vector<64x128xf32> -> vector<64x128xf32>
    %20 = vector.extract_strided_slice %15 {offsets = [0, 0], sizes = [64, 128], strides = [1, 1]} : vector<80x128xf32> to vector<64x128xf32>
    %c1_18 = arith.constant 1 : index
    %c0_19 = arith.constant 0 : index
    %c0_20 = arith.constant 0 : index
    %21 = vector.load %arg4[%c1_18, %c0_19, %c0_20] : memref<9x128x128xf32, #tpu.memory_space<vmem>>, vector<1x128x128xf32>
    %22 = vector.shape_cast %21 : vector<1x128x128xf32> to vector<128x128xf32>
    %cst_21 = arith.constant dense<0.000000e+00> : vector<64x128xf32>
    %23 = tpu.matmul %20, %22, %cst_21 {dimension_numbers = #tpu.dot_dimension_numbers<[1], [0], [0], [1], [0, 0, 1, 1], [], []>} : vector<64x128xf32>, vector<128x128xf32>, vector<64x128xf32> -> vector<64x128xf32>
    %24 = vector.extract_strided_slice %15 {offsets = [0, 0], sizes = [64, 128], strides = [1, 1]} : vector<80x128xf32> to vector<64x128xf32>
    %c2_22 = arith.constant 2 : index
    %c0_23 = arith.constant 0 : index
    %c0_24 = arith.constant 0 : index
    %25 = vector.load %arg4[%c2_22, %c0_23, %c0_24] : memref<9x128x128xf32, #tpu.memory_space<vmem>>, vector<1x128x128xf32>
    %26 = vector.shape_cast %25 : vector<1x128x128xf32> to vector<128x128xf32>
    %cst_25 = arith.constant dense<0.000000e+00> : vector<64x128xf32>
    %27 = tpu.matmul %24, %26, %cst_25 {dimension_numbers = #tpu.dot_dimension_numbers<[1], [0], [0], [1], [0, 0, 1, 1], [], []>} : vector<64x128xf32>, vector<128x128xf32>, vector<64x128xf32> -> vector<64x128xf32>
    %28 = vector.extract_strided_slice %15 {offsets = [8, 0], sizes = [64, 128], strides = [1, 1]} : vector<80x128xf32> to vector<64x128xf32>
    %c3_26 = arith.constant 3 : index
    %c0_27 = arith.constant 0 : index
    %c0_28 = arith.constant 0 : index
    %29 = vector.load %arg4[%c3_26, %c0_27, %c0_28] : memref<9x128x128xf32, #tpu.memory_space<vmem>>, vector<1x128x128xf32>
    %30 = vector.shape_cast %29 : vector<1x128x128xf32> to vector<128x128xf32>
    %cst_29 = arith.constant dense<0.000000e+00> : vector<64x128xf32>
    %31 = tpu.matmul %28, %30, %cst_29 {dimension_numbers = #tpu.dot_dimension_numbers<[1], [0], [0], [1], [0, 0, 1, 1], [], []>} : vector<64x128xf32>, vector<128x128xf32>, vector<64x128xf32> -> vector<64x128xf32>
    %32 = vector.extract_strided_slice %15 {offsets = [8, 0], sizes = [64, 128], strides = [1, 1]} : vector<80x128xf32> to vector<64x128xf32>
    %c4_30 = arith.constant 4 : index
    %c0_31 = arith.constant 0 : index
    %c0_32 = arith.constant 0 : index
    %33 = vector.load %arg4[%c4_30, %c0_31, %c0_32] : memref<9x128x128xf32, #tpu.memory_space<vmem>>, vector<1x128x128xf32>
    %34 = vector.shape_cast %33 : vector<1x128x128xf32> to vector<128x128xf32>
    %cst_33 = arith.constant dense<0.000000e+00> : vector<64x128xf32>
    %35 = tpu.matmul %32, %34, %cst_33 {dimension_numbers = #tpu.dot_dimension_numbers<[1], [0], [0], [1], [0, 0, 1, 1], [], []>} : vector<64x128xf32>, vector<128x128xf32>, vector<64x128xf32> -> vector<64x128xf32>
    %36 = vector.extract_strided_slice %15 {offsets = [8, 0], sizes = [64, 128], strides = [1, 1]} : vector<80x128xf32> to vector<64x128xf32>
    %c5_34 = arith.constant 5 : index
    %c0_35 = arith.constant 0 : index
    %c0_36 = arith.constant 0 : index
    %37 = vector.load %arg4[%c5_34, %c0_35, %c0_36] : memref<9x128x128xf32, #tpu.memory_space<vmem>>, vector<1x128x128xf32>
    %38 = vector.shape_cast %37 : vector<1x128x128xf32> to vector<128x128xf32>
    %cst_37 = arith.constant dense<0.000000e+00> : vector<64x128xf32>
    %39 = tpu.matmul %36, %38, %cst_37 {dimension_numbers = #tpu.dot_dimension_numbers<[1], [0], [0], [1], [0, 0, 1, 1], [], []>} : vector<64x128xf32>, vector<128x128xf32>, vector<64x128xf32> -> vector<64x128xf32>
    %40 = vector.extract_strided_slice %15 {offsets = [16, 0], sizes = [64, 128], strides = [1, 1]} : vector<80x128xf32> to vector<64x128xf32>
    %c6_38 = arith.constant 6 : index
    %c0_39 = arith.constant 0 : index
    %c0_40 = arith.constant 0 : index
    %41 = vector.load %arg4[%c6_38, %c0_39, %c0_40] : memref<9x128x128xf32, #tpu.memory_space<vmem>>, vector<1x128x128xf32>
    %42 = vector.shape_cast %41 : vector<1x128x128xf32> to vector<128x128xf32>
    %cst_41 = arith.constant dense<0.000000e+00> : vector<64x128xf32>
    %43 = tpu.matmul %40, %42, %cst_41 {dimension_numbers = #tpu.dot_dimension_numbers<[1], [0], [0], [1], [0, 0, 1, 1], [], []>} : vector<64x128xf32>, vector<128x128xf32>, vector<64x128xf32> -> vector<64x128xf32>
    %44 = vector.extract_strided_slice %15 {offsets = [16, 0], sizes = [64, 128], strides = [1, 1]} : vector<80x128xf32> to vector<64x128xf32>
    %c7_42 = arith.constant 7 : index
    %c0_43 = arith.constant 0 : index
    %c0_44 = arith.constant 0 : index
    %45 = vector.load %arg4[%c7_42, %c0_43, %c0_44] : memref<9x128x128xf32, #tpu.memory_space<vmem>>, vector<1x128x128xf32>
    %46 = vector.shape_cast %45 : vector<1x128x128xf32> to vector<128x128xf32>
    %cst_45 = arith.constant dense<0.000000e+00> : vector<64x128xf32>
    %47 = tpu.matmul %44, %46, %cst_45 {dimension_numbers = #tpu.dot_dimension_numbers<[1], [0], [0], [1], [0, 0, 1, 1], [], []>} : vector<64x128xf32>, vector<128x128xf32>, vector<64x128xf32> -> vector<64x128xf32>
    %48 = vector.extract_strided_slice %15 {offsets = [16, 0], sizes = [64, 128], strides = [1, 1]} : vector<80x128xf32> to vector<64x128xf32>
    %c8 = arith.constant 8 : index
    %c0_46 = arith.constant 0 : index
    %c0_47 = arith.constant 0 : index
    %49 = vector.load %arg4[%c8, %c0_46, %c0_47] : memref<9x128x128xf32, #tpu.memory_space<vmem>>, vector<1x128x128xf32>
    %50 = vector.shape_cast %49 : vector<1x128x128xf32> to vector<128x128xf32>
    %cst_48 = arith.constant dense<0.000000e+00> : vector<64x128xf32>
    %51 = tpu.matmul %48, %50, %cst_48 {dimension_numbers = #tpu.dot_dimension_numbers<[1], [0], [0], [1], [0, 0, 1, 1], [], []>} : vector<64x128xf32>, vector<128x128xf32>, vector<64x128xf32> -> vector<64x128xf32>
    %52 = arith.addf %19, %23 : vector<64x128xf32>
    %53 = arith.addf %27, %31 : vector<64x128xf32>
    %54 = arith.addf %35, %39 : vector<64x128xf32>
    %55 = arith.addf %43, %47 : vector<64x128xf32>
    %56 = arith.addf %52, %53 : vector<64x128xf32>
    %57 = arith.addf %54, %55 : vector<64x128xf32>
    %58 = arith.addf %56, %57 : vector<64x128xf32>
    %59 = arith.addf %58, %51 : vector<64x128xf32>
    %60 = vector.broadcast %1 : vector<1x128xf32> to vector<64x128xf32>
    %61 = arith.addf %59, %60 : vector<64x128xf32>
    %cst_49 = arith.constant 0.000000e+00 : f32
    %62 = vector.broadcast %cst_49 : f32 to vector<64x128xf32>
    %63 = arith.maximumf %61, %62 : vector<64x128xf32>
    %64 = vector.extract_strided_slice %63 {offsets = [0, 0], sizes = [8, 128], strides = [1, 1]} : vector<64x128xf32> to vector<8x128xf32>
    %c0_50 = arith.constant 0 : index
    %c0_51 = arith.constant 0 : index
    %c0_52 = arith.constant 0 : index
    %65 = vector.load %arg5[%c0_50, %c0_51, %c0_52] : memref<8x128x32xf32, #tpu.memory_space<vmem>>, vector<1x128x32xf32>
    %66 = vector.shape_cast %65 : vector<1x128x32xf32> to vector<128x32xf32>
    %cst_53 = arith.constant dense<0.000000e+00> : vector<8x32xf32>
    %67 = tpu.matmul %64, %66, %cst_53 {dimension_numbers = #tpu.dot_dimension_numbers<[1], [0], [0], [1], [0, 0, 1, 1], [], []>} : vector<8x128xf32>, vector<128x32xf32>, vector<8x32xf32> -> vector<8x32xf32>
    %68 = vector.extract_strided_slice %63 {offsets = [8, 0], sizes = [8, 128], strides = [1, 1]} : vector<64x128xf32> to vector<8x128xf32>
    %c1_54 = arith.constant 1 : index
    %c0_55 = arith.constant 0 : index
    %c0_56 = arith.constant 0 : index
    %69 = vector.load %arg5[%c1_54, %c0_55, %c0_56] : memref<8x128x32xf32, #tpu.memory_space<vmem>>, vector<1x128x32xf32>
    %70 = vector.shape_cast %69 : vector<1x128x32xf32> to vector<128x32xf32>
    %cst_57 = arith.constant dense<0.000000e+00> : vector<8x32xf32>
    %71 = tpu.matmul %68, %70, %cst_57 {dimension_numbers = #tpu.dot_dimension_numbers<[1], [0], [0], [1], [0, 0, 1, 1], [], []>} : vector<8x128xf32>, vector<128x32xf32>, vector<8x32xf32> -> vector<8x32xf32>
    %72 = vector.extract_strided_slice %63 {offsets = [16, 0], sizes = [8, 128], strides = [1, 1]} : vector<64x128xf32> to vector<8x128xf32>
    %c2_58 = arith.constant 2 : index
    %c0_59 = arith.constant 0 : index
    %c0_60 = arith.constant 0 : index
    %73 = vector.load %arg5[%c2_58, %c0_59, %c0_60] : memref<8x128x32xf32, #tpu.memory_space<vmem>>, vector<1x128x32xf32>
    %74 = vector.shape_cast %73 : vector<1x128x32xf32> to vector<128x32xf32>
    %cst_61 = arith.constant dense<0.000000e+00> : vector<8x32xf32>
    %75 = tpu.matmul %72, %74, %cst_61 {dimension_numbers = #tpu.dot_dimension_numbers<[1], [0], [0], [1], [0, 0, 1, 1], [], []>} : vector<8x128xf32>, vector<128x32xf32>, vector<8x32xf32> -> vector<8x32xf32>
    %76 = vector.extract_strided_slice %63 {offsets = [24, 0], sizes = [8, 128], strides = [1, 1]} : vector<64x128xf32> to vector<8x128xf32>
    %c3_62 = arith.constant 3 : index
    %c0_63 = arith.constant 0 : index
    %c0_64 = arith.constant 0 : index
    %77 = vector.load %arg5[%c3_62, %c0_63, %c0_64] : memref<8x128x32xf32, #tpu.memory_space<vmem>>, vector<1x128x32xf32>
    %78 = vector.shape_cast %77 : vector<1x128x32xf32> to vector<128x32xf32>
    %cst_65 = arith.constant dense<0.000000e+00> : vector<8x32xf32>
    %79 = tpu.matmul %76, %78, %cst_65 {dimension_numbers = #tpu.dot_dimension_numbers<[1], [0], [0], [1], [0, 0, 1, 1], [], []>} : vector<8x128xf32>, vector<128x32xf32>, vector<8x32xf32> -> vector<8x32xf32>
    %80 = vector.extract_strided_slice %63 {offsets = [32, 0], sizes = [8, 128], strides = [1, 1]} : vector<64x128xf32> to vector<8x128xf32>
    %c4_66 = arith.constant 4 : index
    %c0_67 = arith.constant 0 : index
    %c0_68 = arith.constant 0 : index
    %81 = vector.load %arg5[%c4_66, %c0_67, %c0_68] : memref<8x128x32xf32, #tpu.memory_space<vmem>>, vector<1x128x32xf32>
    %82 = vector.shape_cast %81 : vector<1x128x32xf32> to vector<128x32xf32>
    %cst_69 = arith.constant dense<0.000000e+00> : vector<8x32xf32>
    %83 = tpu.matmul %80, %82, %cst_69 {dimension_numbers = #tpu.dot_dimension_numbers<[1], [0], [0], [1], [0, 0, 1, 1], [], []>} : vector<8x128xf32>, vector<128x32xf32>, vector<8x32xf32> -> vector<8x32xf32>
    %84 = vector.extract_strided_slice %63 {offsets = [40, 0], sizes = [8, 128], strides = [1, 1]} : vector<64x128xf32> to vector<8x128xf32>
    %c5_70 = arith.constant 5 : index
    %c0_71 = arith.constant 0 : index
    %c0_72 = arith.constant 0 : index
    %85 = vector.load %arg5[%c5_70, %c0_71, %c0_72] : memref<8x128x32xf32, #tpu.memory_space<vmem>>, vector<1x128x32xf32>
    %86 = vector.shape_cast %85 : vector<1x128x32xf32> to vector<128x32xf32>
    %cst_73 = arith.constant dense<0.000000e+00> : vector<8x32xf32>
    %87 = tpu.matmul %84, %86, %cst_73 {dimension_numbers = #tpu.dot_dimension_numbers<[1], [0], [0], [1], [0, 0, 1, 1], [], []>} : vector<8x128xf32>, vector<128x32xf32>, vector<8x32xf32> -> vector<8x32xf32>
    %88 = vector.extract_strided_slice %63 {offsets = [48, 0], sizes = [8, 128], strides = [1, 1]} : vector<64x128xf32> to vector<8x128xf32>
    %c6_74 = arith.constant 6 : index
    %c0_75 = arith.constant 0 : index
    %c0_76 = arith.constant 0 : index
    %89 = vector.load %arg5[%c6_74, %c0_75, %c0_76] : memref<8x128x32xf32, #tpu.memory_space<vmem>>, vector<1x128x32xf32>
    %90 = vector.shape_cast %89 : vector<1x128x32xf32> to vector<128x32xf32>
    %cst_77 = arith.constant dense<0.000000e+00> : vector<8x32xf32>
    %91 = tpu.matmul %88, %90, %cst_77 {dimension_numbers = #tpu.dot_dimension_numbers<[1], [0], [0], [1], [0, 0, 1, 1], [], []>} : vector<8x128xf32>, vector<128x32xf32>, vector<8x32xf32> -> vector<8x32xf32>
    %92 = vector.extract_strided_slice %63 {offsets = [56, 0], sizes = [8, 128], strides = [1, 1]} : vector<64x128xf32> to vector<8x128xf32>
    %c7_78 = arith.constant 7 : index
    %c0_79 = arith.constant 0 : index
    %c0_80 = arith.constant 0 : index
    %93 = vector.load %arg5[%c7_78, %c0_79, %c0_80] : memref<8x128x32xf32, #tpu.memory_space<vmem>>, vector<1x128x32xf32>
    %94 = vector.shape_cast %93 : vector<1x128x32xf32> to vector<128x32xf32>
    %cst_81 = arith.constant dense<0.000000e+00> : vector<8x32xf32>
    %95 = tpu.matmul %92, %94, %cst_81 {dimension_numbers = #tpu.dot_dimension_numbers<[1], [0], [0], [1], [0, 0, 1, 1], [], []>} : vector<8x128xf32>, vector<128x32xf32>, vector<8x32xf32> -> vector<8x32xf32>
    %96 = arith.addf %67, %71 : vector<8x32xf32>
    %97 = arith.addf %75, %79 : vector<8x32xf32>
    %98 = arith.addf %83, %87 : vector<8x32xf32>
    %99 = arith.addf %91, %95 : vector<8x32xf32>
    %100 = arith.addf %96, %97 : vector<8x32xf32>
    %101 = arith.addf %98, %99 : vector<8x32xf32>
    %102 = arith.addf %100, %101 : vector<8x32xf32>
    %103 = vector.broadcast %2 : vector<1x32xf32> to vector<8x32xf32>
    %104 = arith.addf %102, %103 : vector<8x32xf32>
    %cst_82 = arith.constant dense<0.000000e+00> : vector<8xf32>
    %105 = vector.multi_reduction <add>, %104, %cst_82 [1] : vector<8x32xf32> to vector<8xf32>
    %106 = vector.shape_cast %105 : vector<8xf32> to vector<8x1xf32>
    %cst_83 = arith.constant 3.200000e+01 : f32
    %107 = vector.broadcast %cst_83 : f32 to vector<8x1xf32>
    %108 = arith.divf %106, %107 : vector<8x1xf32>
    %109 = vector.broadcast %108 : vector<8x1xf32> to vector<8x32xf32>
    %110 = arith.subf %104, %109 : vector<8x32xf32>
    %111 = arith.mulf %110, %110 : vector<8x32xf32>
    %cst_84 = arith.constant dense<0.000000e+00> : vector<8xf32>
    %112 = vector.multi_reduction <add>, %111, %cst_84 [1] : vector<8x32xf32> to vector<8xf32>
    %113 = vector.shape_cast %112 : vector<8xf32> to vector<8x1xf32>
    %cst_85 = arith.constant 3.200000e+01 : f32
    %114 = vector.broadcast %cst_85 : f32 to vector<8x1xf32>
    %115 = arith.divf %113, %114 : vector<8x1xf32>
    %cst_86 = arith.constant 9.99999974E-6 : f32
    %116 = vector.broadcast %cst_86 : f32 to vector<8x1xf32>
    %117 = arith.addf %115, %116 : vector<8x1xf32>
    %118 = math.rsqrt %117 : vector<8x1xf32>
    %119 = vector.broadcast %118 : vector<8x1xf32> to vector<8x32xf32>
    %120 = arith.mulf %110, %119 : vector<8x32xf32>
    %121 = vector.broadcast %3 : vector<1x32xf32> to vector<8x32xf32>
    %122 = arith.mulf %120, %121 : vector<8x32xf32>
    %123 = vector.broadcast %4 : vector<1x32xf32> to vector<8x32xf32>
    %124 = arith.addf %122, %123 : vector<8x32xf32>
    %c0_87 = arith.constant 0 : index
    %c0_88 = arith.constant 0 : index
    %c0_89 = arith.constant 0 : index
    %125 = vector.load %arg6[%c0_87, %c0_88, %c0_89] : memref<3x32x32xf32, #tpu.memory_space<vmem>>, vector<1x32x32xf32>
    %126 = vector.shape_cast %125 : vector<1x32x32xf32> to vector<32x32xf32>
    %cst_90 = arith.constant dense<0.000000e+00> : vector<8x32xf32>
    %127 = tpu.matmul %124, %126, %cst_90 {dimension_numbers = #tpu.dot_dimension_numbers<[1], [0], [0], [1], [0, 0, 1, 1], [], []>} : vector<8x32xf32>, vector<32x32xf32>, vector<8x32xf32> -> vector<8x32xf32>
    %128 = vector.broadcast %5 : vector<1x32xf32> to vector<8x32xf32>
    %129 = arith.addf %127, %128 : vector<8x32xf32>
    %cst_91 = arith.constant 0.000000e+00 : f32
    %130 = vector.broadcast %cst_91 : f32 to vector<8x32xf32>
    %131 = arith.maximumf %129, %130 : vector<8x32xf32>
    %c1_92 = arith.constant 1 : index
    %c0_93 = arith.constant 0 : index
    %c0_94 = arith.constant 0 : index
    %132 = vector.load %arg6[%c1_92, %c0_93, %c0_94] : memref<3x32x32xf32, #tpu.memory_space<vmem>>, vector<1x32x32xf32>
    %133 = vector.shape_cast %132 : vector<1x32x32xf32> to vector<32x32xf32>
    %cst_95 = arith.constant dense<0.000000e+00> : vector<8x32xf32>
    %134 = tpu.matmul %131, %133, %cst_95 {dimension_numbers = #tpu.dot_dimension_numbers<[1], [0], [0], [1], [0, 0, 1, 1], [], []>} : vector<8x32xf32>, vector<32x32xf32>, vector<8x32xf32> -> vector<8x32xf32>
    %135 = vector.broadcast %6 : vector<1x32xf32> to vector<8x32xf32>
    %136 = arith.addf %134, %135 : vector<8x32xf32>
    %cst_96 = arith.constant 0.000000e+00 : f32
    %137 = vector.broadcast %cst_96 : f32 to vector<8x32xf32>
    %138 = arith.maximumf %136, %137 : vector<8x32xf32>
    %c2_97 = arith.constant 2 : index
    %c0_98 = arith.constant 0 : index
    %c0_99 = arith.constant 0 : index
    %139 = vector.load %arg6[%c2_97, %c0_98, %c0_99] : memref<3x32x32xf32, #tpu.memory_space<vmem>>, vector<1x32x32xf32>
    %140 = vector.shape_cast %139 : vector<1x32x32xf32> to vector<32x32xf32>
    %cst_100 = arith.constant dense<0.000000e+00> : vector<8x32xf32>
    %141 = tpu.matmul %138, %140, %cst_100 {dimension_numbers = #tpu.dot_dimension_numbers<[1], [0], [0], [1], [0, 0, 1, 1], [], []>} : vector<8x32xf32>, vector<32x32xf32>, vector<8x32xf32> -> vector<8x32xf32>
    %142 = vector.extract_strided_slice %141 {offsets = [0, 0], sizes = [8, 8], strides = [1, 1]} : vector<8x32xf32> to vector<8x8xf32>
    %143 = vector.broadcast %7 : vector<1x8xf32> to vector<8x8xf32>
    %144 = arith.addf %142, %143 : vector<8x8xf32>
    %145 = vector.extract_strided_slice %144 {offsets = [0, 0], sizes = [8, 4], strides = [1, 1]} : vector<8x8xf32> to vector<8x4xf32>
    %146 = vector.extract_strided_slice %144 {offsets = [0, 4], sizes = [8, 4], strides = [1, 1]} : vector<8x8xf32> to vector<8x4xf32>
    %147 = math.tanh %146 : vector<8x4xf32>
    %cst_101 = arith.constant 1.000000e+00 : f32
    %148 = vector.broadcast %cst_101 : f32 to vector<8x4xf32>
    %149 = arith.addf %147, %148 : vector<8x4xf32>
    %cst_102 = arith.constant 6.000000e+00 : f32
    %150 = vector.broadcast %cst_102 : f32 to vector<8x4xf32>
    %151 = arith.mulf %150, %149 : vector<8x4xf32>
    %cst_103 = arith.constant -1.000000e+01 : f32
    %152 = vector.broadcast %cst_103 : f32 to vector<8x4xf32>
    %153 = arith.addf %152, %151 : vector<8x4xf32>
    %154 = math.exp %153 : vector<8x4xf32>
    %c0_104 = arith.constant 0 : index
    %c0_105 = arith.constant 0 : index
    %155 = vector.load %arg2[%c0_104, %c0_105] : memref<8x4xf32, #tpu.memory_space<vmem>>, vector<8x4xf32>
    %156 = arith.mulf %155, %154 : vector<8x4xf32>
    %157 = arith.addf %145, %156 : vector<8x4xf32>
    %cst_106 = arith.constant -5.000000e-01 : f32
    %158 = vector.broadcast %cst_106 : f32 to vector<8x4xf32>
    %159 = arith.mulf %158, %155 : vector<8x4xf32>
    %160 = arith.mulf %159, %155 : vector<8x4xf32>
    %161 = arith.subf %160, %153 : vector<8x4xf32>
    %cst_107 = arith.constant dense<0.000000e+00> : vector<8xf32>
    %162 = vector.multi_reduction <add>, %161, %cst_107 [1] : vector<8x4xf32> to vector<8xf32>
    %163 = vector.shape_cast %162 : vector<8xf32> to vector<8x1xf32>
    %cst_108 = arith.constant 3.67575407 : f32
    %164 = vector.broadcast %cst_108 : f32 to vector<8x1xf32>
    %165 = arith.subf %163, %164 : vector<8x1xf32>
    %166 = math.tanh %145 : vector<8x4xf32>
    %167 = math.tanh %157 : vector<8x4xf32>
    %168 = arith.mulf %167, %167 : vector<8x4xf32>
    %cst_109 = arith.constant 1.000000e+00 : f32
    %169 = vector.broadcast %cst_109 : f32 to vector<8x4xf32>
    %170 = arith.subf %169, %168 : vector<8x4xf32>
    %cst_110 = arith.constant 0.000000e+00 : f32
    %171 = vector.broadcast %cst_110 : f32 to vector<8x4xf32>
    %172 = arith.maximumf %170, %171 : vector<8x4xf32>
    %cst_111 = arith.constant 9.99999997E-7 : f32
    %173 = vector.broadcast %cst_111 : f32 to vector<8x4xf32>
    %174 = arith.addf %172, %173 : vector<8x4xf32>
    %175 = math.log %174 : vector<8x4xf32>
    %cst_112 = arith.constant dense<0.000000e+00> : vector<8xf32>
    %176 = vector.multi_reduction <add>, %175, %cst_112 [1] : vector<8x4xf32> to vector<8xf32>
    %177 = vector.shape_cast %176 : vector<8xf32> to vector<8x1xf32>
    %178 = arith.subf %165, %177 : vector<8x1xf32>
    %cst_113 = arith.constant 0.000000e+00 : f32
    %179 = vector.broadcast %cst_113 : f32 to vector<8x115xf32>
    %180 = tpu.concatenate %166, %167, %153, %178, %179 in 1 : vector<8x4xf32>, vector<8x4xf32>, vector<8x4xf32>, vector<8x1xf32>, vector<8x115xf32> -> vector<8x128xf32>
    %c0_114 = arith.constant 0 : index
    %c0_115 = arith.constant 0 : index
    %181 = vector.load %arg8[%c0_114, %c0_115] : memref<8x128xf32, #tpu.memory_space<vmem>>, vector<8x128xf32>
    tpu.vector_store %arg8[%c0_114, %c0_115], %180 {strides = array<i32>} : memref<8x128xf32, #tpu.memory_space<vmem>>, vector<8x128xf32>,
    return
  }
  func.func @transform_0(%arg0: i32) -> (i32, i32, i32) {
    %c0_i32 = arith.constant 0 : i32
    %c0_i32_0 = arith.constant 0 : i32
    %c0_i32_1 = arith.constant 0 : i32
    return %arg0, %c0_i32, %c0_i32_0 : i32, i32, i32
  }
  func.func @transform_1(%arg0: i32) -> (i32, i32) {
    %c0_i32 = arith.constant 0 : i32
    %c0_i32_0 = arith.constant 0 : i32
    return %arg0, %c0_i32 : i32, i32
  }
  func.func @transform_2(%arg0: i32) -> (i32, i32) {
    %c0_i32 = arith.constant 0 : i32
    %c0_i32_0 = arith.constant 0 : i32
    %c0_i32_1 = arith.constant 0 : i32
    return %c0_i32, %c0_i32_0 : i32, i32
  }
  func.func @transform_3(%arg0: i32) -> (i32, i32, i32) {
    %c0_i32 = arith.constant 0 : i32
    %c0_i32_0 = arith.constant 0 : i32
    %c0_i32_1 = arith.constant 0 : i32
    %c0_i32_2 = arith.constant 0 : i32
    return %c0_i32, %c0_i32_0, %c0_i32_1 : i32, i32, i32
  }
  func.func @transform_4(%arg0: i32) -> (i32, i32, i32) {
    %c0_i32 = arith.constant 0 : i32
    %c0_i32_0 = arith.constant 0 : i32
    %c0_i32_1 = arith.constant 0 : i32
    %c0_i32_2 = arith.constant 0 : i32
    return %c0_i32, %c0_i32_0, %c0_i32_1 : i32, i32, i32
  }
  func.func @transform_5(%arg0: i32) -> (i32, i32, i32) {
    %c0_i32 = arith.constant 0 : i32
    %c0_i32_0 = arith.constant 0 : i32
    %c0_i32_1 = arith.constant 0 : i32
    %c0_i32_2 = arith.constant 0 : i32
    return %c0_i32, %c0_i32_0, %c0_i32_1 : i32, i32, i32
  }
  func.func @transform_6(%arg0: i32) -> (i32, i32) {
    %c0_i32 = arith.constant 0 : i32
    %c0_i32_0 = arith.constant 0 : i32
    %c0_i32_1 = arith.constant 0 : i32
    return %c0_i32, %c0_i32_0 : i32, i32
  }
  func.func @transform_7(%arg0: i32) -> (i32, i32) {
    %c0_i32 = arith.constant 0 : i32
    %c0_i32_0 = arith.constant 0 : i32
    return %arg0, %c0_i32 : i32, i32
  }
}

</mosaic_0001>

<bundles_post_ra>
// kernel: actor_forward.1
= control target key start
LH: loop header
LB: loop body
LE: loop exit
PB: predicated region body
PF: predicated region fallthrough
CT: control target
= control target key end

     0   :  { %s4411_s24 = smov 0   ;;  %s5860_s0 = inlined_call_operand.vmem [shape: f32[2,80,270], index: 0, kind: input, shape index: {}]   ;;  %s5861_s1 = inlined_call_operand.vmem [shape: f32[16,4], index: 1, kind: input, shape index: {}]   ;;  %s5862_s2 = inlined_call_operand.vmem [shape: f32[270,128], index: 2, kind: input, shape index: {}]   ;;  %s5863_s3 = inlined_call_operand.vmem [shape: f32[9,128,128], index: 3, kind: input, shape index: {}]   ;;  %s5864_s4 = inlined_call_operand.vmem [shape: f32[8,128,32], index: 4, kind: input, shape index: {}]   ;;  %s5865_s5 = inlined_call_operand.vmem [shape: f32[3,32,32], index: 5, kind: input, shape index: {}]   ;;  %s5866_s6 = inlined_call_operand.vmem [shape: f32[8,128], index: 6, kind: input, shape index: {}]   ;;  %s5867_s7 = inlined_call_operand.vmem [shape: f32[16,128], index: 7, kind: output, shape index: {}]  }
   0x1 LB: > { %s2886_s25 = sadd.s32 4294967295, %s4365_s24   ;;  %p2890_p0 = scmp.ge.s32.totalorder %s4365_s24, 1  ;;  %s4365_s24 = sphi %s4411_s24, %s17_s24  }
   0x2   : > { %p246_p1 = scmp.lt.s32.totalorder %s4365_s24, 3 }
   0x4   : > { %p247_p2 = pnand %p2890_p0, %p246_p1 }
   0x5   : > { %p281_p3 = scmp.lt.s32.totalorder (!%p247_p2), %s2886_s25, 1  ;;  %s4369_s12 = smov (!%p247_p2), 124  }
   0x6   : > { %250 = sbr.rel (%p247_p2) target bundleno = 2150 (0x866), region = 48  ;;  %s4370_s16 = smov (!%p247_p2), 4  }
   0xb   : > { %v363_v0 = vld [vmem:[%s5862_s2 + $0xf8] sm:$0xff]  ;;  %v362_v2 = vld [vmem:[%s5862_s2 + $0xf0] sm:$0xff]  ;;  %v361_v4 = vld [vmem:[%s5862_s2 + $0xe8] sm:$0xff]  ;;  %s5872_s25 = smov (!%p281_p3, %s2886_s25), 1  ;;  %vm401_vm0 = vcmask 1045504   ;;  %vm370_vm1 = vcmask 113664  }
   0xc   : > { %v347_v1 = vld [vmem:[%s5862_s2 + $0x78] sm:$0xff]  ;;  %3167 = vmatprep.subr.mxu0 %v363_v0  ;;  %v346_v3 = vld [vmem:[%s5862_s2 + $0x70] sm:$0xff]  ;;  %v345_v5 = vld [vmem:[%s5862_s2 + $0x68] sm:$0xff]  ;;  %s4336_s17 = smul.u32 240, %s5872_s25  ;;  %vm4368_vm2 = vmmov 0   ;;  %vm2497_vm3 = vcmask 261120  }
   0xd   : > { %3168 = vmatpush3.msra.mxu0 %v347_v1  ;;  %v360_v6 = vld [vmem:[%s5862_s2 + $0xe0] sm:$0xff]  ;;  %v359_v8 = vld [vmem:[%s5862_s2 + $0xd8] sm:$0xff]  ;;  %v358_v10 = vld [vmem:[%s5862_s2 + $0xd0] sm:$0xff]  ;;  %s2892_s13 = sshll.u32 %s5872_s25, 3  ;;  %vm2790_vm4 = vcmask 31744   ;;  %vm2814_vm5 = vcmask 64512  }
   0xe   : > { %3169 = vmatprep.subr.mxu0 %v362_v2  ;;  %v344_v7 = vld [vmem:[%s5862_s2 + $0x60] sm:$0xff]  ;;  %v343_v9 = vld [vmem:[%s5862_s2 + $0x58] sm:$0xff]  ;;  %s4455_s28 = scalar_lea.vmem %s5860_s0, %s4336_s17  ;;  %v342_v11 = vld [vmem:[%s5862_s2 + $0x50] sm:$0xff]  ;;  %s289_s15 = scalar_lea.vmem %s5861_s1, %s2892_s13  ;;  %vm2816_vm6 = vcmask 97280   ;;  %vm2818_vm7 = vcmask 105472  }
   0xf   : > { %3170 = vmatpush3.msra.mxu0 %v346_v3  ;;  %v357_v12 = vld [vmem:[%s5862_s2 + $0xc8] sm:$0xff]  ;;  %v364_v16 = vld [vmem:[%s5862_s2 + $0x100] sm:$0xff]  ;;  %v304_v19 = vld [vmem:[%s4455_s28 + $0x10] sm:$0xff]  ;;  %s293_s19 = scalar_lea.vmem %s5867_s7, %s2892_s13 }
  0x10   : > { %3171 = vmatprep.subr.mxu0 %v361_v4  ;;  %v303_v13 = vld [vmem:[%s4455_s28 + $0x8] sm:$0xff]  ;;  %v356_v17 = vld [vmem:[%s5862_s2 + $0xc0] sm:$0xff]  ;;  %v355_v20 = vld [vmem:[%s5862_s2 + $0xb8] sm:$0xff]  ;;  %3612 = vmatprep.mubr.msk.f32.mxu1 %vm370_vm1, %v304_v19 }
  0x11   : > { %3172 = vmatpush3.msra.mxu0 %v345_v5  ;;  %v341_v14 = vld [vmem:[%s5862_s2 + $0x48] sm:$0xff]  ;;  %469 = vmatprep.mubr.f32.mxu0 %v303_v13  ;;  %v340_v18 = vld [vmem:[%s5862_s2 + $0x40] sm:$0xff]  ;;  %v339_v22 = vld [vmem:[%s5862_s2 + $0x38] sm:$0xff] }
  0x12   : > { %3173 = vmatprep.subr.mxu0 %v360_v6  ;;  %v365_v15 = vld [vmem:[%s5862_s2 + $0x108] sm:$0x3f]  ;;  %v310_v23 = vld [vmem:[%s4455_s28 + $0x40] sm:$0xff]  ;;  %v354_v24 = vld [vmem:[%s5862_s2 + $0xb0] sm:$0xff] }
  0x13   : > { %3174 = vmatpush3.msra.mxu0 %v344_v7  ;;  %3608 = vmatprep.subr.msk.mxu1 %vm401_vm0, %v365_v15  ;;  %v307_v21 = vld [vmem:[%s4455_s28 + $0x28] sm:$0xff]  ;;  %v338_v25 = vld [vmem:[%s5862_s2 + $0x30] sm:$0xff]  ;;  %v313_v27 = vld [vmem:[%s4455_s28 + $0x58] sm:$0xff] }
  0x14   : > { %3175 = vmatprep.subr.mxu0 %v359_v8  ;;  %3609 = vmatpush3.msk.msra.mxu1 %vm401_vm0, %v365_v15  ;;  %v353_v26 = vld [vmem:[%s5862_s2 + $0xa8] sm:$0xff]  ;;  %v316_v29 = vld [vmem:[%s4455_s28 + $0x70] sm:$0xff]  ;;  %v352_v30 = vld [vmem:[%s5862_s2 + $0xa0] sm:$0xff] }
  0x15   : > { %3176 = vmatpush3.msra.mxu0 %v343_v9  ;;  %3610 = vmatprep.subr.mxu1 %v364_v16  ;;  %v337_v28 = vld [vmem:[%s5862_s2 + $0x28] sm:$0xff]  ;;  %v336_v31 = vld [vmem:[%s5862_s2 + $0x20] sm:$0xff]  ;;  %v2921_v32 = vld [vmem:[%s5863_s3 + $0xf8] sm:$0xff] }
  0x16   : > { %3177 = vmatprep.subr.mxu0 %v358_v10  ;;  %3611 = vmatpush3.msra.mxu1 %v364_v16  ;;  %v351_v33 = vld [vmem:[%s5862_s2 + $0x98] sm:$0xff]  ;;  %v319_v34 = vld [vmem:[%s4455_s28 + $0x88] sm:$0xff]  ;;  %v322_v36 = vld [vmem:[%s4455_s28 + $0xa0] sm:$0xff] }
  0x17   : > { %3178 = vmatpush3.msra.mxu0 %v342_v11  ;;  %3613 = vmatmul.mubr.msk.f32.vlgmr.msra.gmra.mxu1 %vm370_vm1, %v307_v21  ;;  %v335_v35 = vld [vmem:[%s5862_s2 + $0x18] sm:$0xff]  ;;  %v350_v37 = vld [vmem:[%s5862_s2 + $0x90] sm:$0xff]  ;;  %v349_v40 = vld [vmem:[%s5862_s2 + $0x88] sm:$0xff] }
  0x18   : > { %3179 = vmatprep.subr.mxu0 %v357_v12  ;;  %3615 = vmatprep.mubr.msk.f32.mxu1 %vm370_vm1, %v310_v23  ;;  %v2920_v38 = vld [vmem:[%s5863_s3 + $0xf0] sm:$0xff]  ;;  %v325_v41 = vld [vmem:[%s4455_s28 + $0xb8] sm:$0xff]  ;;  %v333_v42 = vld [vmem:[%s5862_s2 + $0x8] sm:$0xff] }
  0x19   : > { %3180 = vmatpush3.msra.mxu0 %v341_v14  ;;  %3627 = vmatprep.subr.mxu1 %v2921_v32  ;;  %v334_v39 = vld [vmem:[%s5862_s2 + $0x10] sm:$0xff]  ;;  %v348_v44 = vld [vmem:[%s5862_s2 + $0x80] sm:$0xff]  ;;  %v2919_v45 = vld [vmem:[%s5863_s3 + $0xe8] sm:$0xff] }
  0x1a   : > { %3181 = vmatprep.subr.mxu0 %v356_v17  ;;  %3628 = vmatpush3.msra.mxu1 %v2921_v32  ;;  %v328_v43 = vld [vmem:[%s4455_s28 + $0xd0] sm:$0xff]  ;;  %v332_v46 = vld [vmem:[%s5862_s2] sm:$0xff]  ;;  %v331_v48 = vld [vmem:[%s4455_s28 + $0xe8] sm:$0xff] }
  0x1b   : > { %3182 = vmatpush3.msra.mxu0 %v340_v18  ;;  %3616 = vmatmul.mubr.msk.f32.gmra.mxu1 %vm370_vm1, %v313_v27  ;;  %v302_v47 = vld [vmem:[%s4455_s28] sm:$0xff]  ;;  %v2985_v50 = vld [vmem:[%s5863_s3 + $0x2f8] sm:$0xff]  ;;  %v2984_v52 = vld [vmem:[%s5863_s3 + $0x2f0] sm:$0xff] }
  0x1c   : > { %3183 = vmatprep.subr.mxu0 %v355_v20  ;;  %3618 = vmatprep.mubr.msk.f32.mxu1 %vm370_vm1, %v316_v29  ;;  %v306_v49 = vld [vmem:[%s4455_s28 + $0x20] sm:$0xff]  ;;  %v305_v53 = vld [vmem:[%s4455_s28 + $0x18] sm:$0xff]  ;;  %v2983_v56 = vld [vmem:[%s5863_s3 + $0x2e8] sm:$0xff] }
  0x1d   : > { %3184 = vmatpush3.msra.mxu0 %v339_v22  ;;  %3629 = vmatprep.subr.mxu1 %v2920_v38  ;;  %v2918_v51 = vld [vmem:[%s5863_s3 + $0xe0] sm:$0xff]  ;;  %v2917_v54 = vld [vmem:[%s5863_s3 + $0xd8] sm:$0xff]  ;;  %v2916_v57 = vld [vmem:[%s5863_s3 + $0xd0] sm:$0xff] }
  0x1e   : > { %3185 = vmatprep.subr.mxu0 %v354_v24  ;;  %3630 = vmatpush3.msra.mxu1 %v2920_v38  ;;  %v309_v55 = vld [vmem:[%s4455_s28 + $0x38] sm:$0xff]  ;;  %v308_v58 = vld [vmem:[%s4455_s28 + $0x30] sm:$0xff]  ;;  %v2982_v59 = vld [vmem:[%s5863_s3 + $0x2e0] sm:$0xff] }
  0x1f   : > { %3186 = vmatpush3.msra.mxu0 %v338_v25  ;;  %3619 = vmatmul.mubr.msk.f32.gmra.mxu1 %vm370_vm1, %v319_v34  ;;  %v312_v60 = vld [vmem:[%s4455_s28 + $0x50] sm:$0xff]  ;;  %v2915_v61 = vld [vmem:[%s5863_s3 + $0xc8] sm:$0xff]  ;;  %v2981_v62 = vld [vmem:[%s5863_s3 + $0x2d8] sm:$0xff] }
  0x20   : > { %3187 = vmatprep.subr.mxu0 %v353_v26  ;;  %3621 = vmatprep.mubr.msk.f32.mxu1 %vm370_vm1, %v322_v36  ;;  %v311_v63 = vld [vmem:[%s4455_s28 + $0x48] sm:$0xff]  ;;  %v2914_v0 = vld [vmem:[%s5863_s3 + $0xc0] sm:$0xff]  ;;  %v2980_v2 = vld [vmem:[%s5863_s3 + $0x2d0] sm:$0xff] }
  0x21   : > { %3188 = vmatpush3.msra.mxu0 %v337_v28  ;;  %3631 = vmatprep.subr.mxu1 %v2919_v45  ;;  %v315_v1 = vld [vmem:[%s4455_s28 + $0x68] sm:$0xff]  ;;  %v2913_v3 = vld [vmem:[%s5863_s3 + $0xb8] sm:$0xff]  ;;  %v314_v4 = vld [vmem:[%s4455_s28 + $0x60] sm:$0xff] }
  0x22   : > { %3189 = vmatprep.subr.mxu0 %v352_v30  ;;  %3632 = vmatpush3.msra.mxu1 %v2919_v45  ;;  %v2979_v5 = vld [vmem:[%s5863_s3 + $0x2c8] sm:$0xff]  ;;  %v318_v6 = vld [vmem:[%s4455_s28 + $0x80] sm:$0xff]  ;;  %v317_v7 = vld [vmem:[%s4455_s28 + $0x78] sm:$0xff] }
  0x23   : > { %3190 = vmatpush3.msra.mxu0 %v336_v31  ;;  %3622 = vmatmul.mubr.msk.f32.gmra.mxu1 %vm370_vm1, %v325_v41  ;;  %v321_v8 = vld [vmem:[%s4455_s28 + $0x98] sm:$0xff]  ;;  %v320_v9 = vld [vmem:[%s4455_s28 + $0x90] sm:$0xff]  ;;  %v323_v11 = vld [vmem:[%s4455_s28 + $0xa8] sm:$0xff] }
  0x24   : > { %3191 = vmatprep.subr.mxu0 %v351_v33  ;;  %3624 = vmatprep.mubr.msk.f32.mxu1 %vm370_vm1, %v328_v43  ;;  %v324_v10 = vld [vmem:[%s4455_s28 + $0xb0] sm:$0xff]  ;;  %v327_v12 = vld [vmem:[%s4455_s28 + $0xc8] sm:$0xff]  ;;  %v326_v13 = vld [vmem:[%s4455_s28 + $0xc0] sm:$0xff] }
  0x25   : > { %3192 = vmatpush3.msra.mxu0 %v335_v35  ;;  %3633 = vmatprep.subr.mxu1 %v2918_v51  ;;  %v330_v14 = vld [vmem:[%s4455_s28 + $0xe0] sm:$0xff]  ;;  %v329_v15 = vld [vmem:[%s4455_s28 + $0xd8] sm:$0xff]  ;;  %v2912_v16 = vld [vmem:[%s5863_s3 + $0xb0] sm:$0xff] }
  0x26   : > { %3193 = vmatprep.subr.mxu0 %v350_v37  ;;  %3634 = vmatpush3.msra.mxu1 %v2918_v51  ;;  %v2978_v17 = vld [vmem:[%s5863_s3 + $0x2c0] sm:$0xff]  ;;  %v2911_v18 = vld [vmem:[%s5863_s3 + $0xa8] sm:$0xff]  ;;  %v2977_v19 = vld [vmem:[%s5863_s3 + $0x2b8] sm:$0xff] }
  0x27   : > { %3194 = vmatpush3.msra.mxu0 %v334_v39  ;;  %3625 = vmatmul.mubr.msk.f32.gmra.mxu1 %vm370_vm1, %v331_v48  ;;  %v2910_v20 = vld [vmem:[%s5863_s3 + $0xa0] sm:$0xff]  ;;  %v2976_v21 = vld [vmem:[%s5863_s3 + $0x2b0] sm:$0xff]  ;;  %v2909_v22 = vld [vmem:[%s5863_s3 + $0x98] sm:$0xff] }
  0x28   : > { %3195 = vmatprep.subr.mxu0 %v349_v40  ;;  %3635 = vmatprep.subr.mxu1 %v2917_v54  ;;  %v2975_v23 = vld [vmem:[%s5863_s3 + $0x2a8] sm:$0xff]  ;;  %v2908_v24 = vld [vmem:[%s5863_s3 + $0x90] sm:$0xff]  ;;  %v2974_v25 = vld [vmem:[%s5863_s3 + $0x2a0] sm:$0xff] }
  0x29   : > { %3196 = vmatpush3.msra.mxu0 %v333_v42  ;;  %3636 = vmatpush3.msra.mxu1 %v2917_v54  ;;  %v2907_v26 = vld [vmem:[%s5863_s3 + $0x88] sm:$0xff]  ;;  %v2973_v27 = vld [vmem:[%s5863_s3 + $0x298] sm:$0xff]  ;;  %v2906_v28 = vld [vmem:[%s5863_s3 + $0x80] sm:$0xff] }
  0x2a   : > { %3197 = vmatprep.subr.mxu0 %v348_v44  ;;  %3637 = vmatprep.subr.mxu1 %v2916_v57  ;;  %v2972_v29 = vld [vmem:[%s5863_s3 + $0x290] sm:$0xff]  ;;  %v2953_v30 = vld [vmem:[%s5863_s3 + $0x1f8] sm:$0xff]  ;;  %v2971_v31 = vld [vmem:[%s5863_s3 + $0x288] sm:$0xff] }
  0x2b   : > { %3198 = vmatpush3.msra.mxu0 %v332_v46  ;;  %3638 = vmatpush3.msra.mxu1 %v2916_v57  ;;  %v2970_v32 = vld [vmem:[%s5863_s3 + $0x280] sm:$0xff]  ;;  %v3033_v33 = vld [vmem:[%s5863_s3 + $0x478] sm:$0xff]  ;;  %v2952_v57 = vld [vmem:[%s5863_s3 + $0x1f0] sm:$0xff] }
  0x2c   : > { %470 = vmatmul.mubr.f32.vlgmr.msra.gmra.mxu0 %v302_v47  ;;  %3715 = vmatprep.subr.mxu0 %v2985_v50  ;;  %v4674_v37 = vld [vmem:[%s5866_s6] ss:$0 sm:$0xff] }
  0x2d   : > { %474 = vmatprep.mubr.f32.mxu0 %v306_v49  ;;  %3716 = vmatpush3.msra.mxu0 %v2985_v50 }
  0x2e   : > { %3717 = vmatprep.subr.mxu0 %v2984_v52  ;;  %3639 = vmatprep.subr.mxu1 %v2915_v61 }
  0x2f   : > { %3718 = vmatpush3.msra.mxu0 %v2984_v52  ;;  %3640 = vmatpush3.msra.mxu1 %v2915_v61  ;;  %v2951_v61 = vld [vmem:[%s5863_s3 + $0x1e8] sm:$0xff] }
  0x30   : > { %475 = vmatmul.mubr.f32.gmra.mxu0 %v305_v53  ;;  %3719 = vmatprep.subr.mxu0 %v2983_v56 }
  0x31   : > { %479 = vmatprep.mubr.f32.mxu0 %v309_v55  ;;  %3720 = vmatpush3.msra.mxu0 %v2983_v56 }
  0x32   : > { %3721 = vmatprep.subr.mxu0 %v2982_v59  ;;  %3641 = vmatprep.subr.mxu1 %v2914_v0 }
  0x33   : > { %3722 = vmatpush3.msra.mxu0 %v2982_v59  ;;  %3642 = vmatpush3.msra.mxu1 %v2914_v0 }
  0x34   : > { %480 = vmatmul.mubr.f32.gmra.mxu0 %v308_v58  ;;  %3723 = vmatprep.subr.mxu0 %v2981_v62 }
  0x35   : > { %484 = vmatprep.mubr.f32.mxu0 %v312_v60  ;;  %3724 = vmatpush3.msra.mxu0 %v2981_v62 }
  0x36   : > { %3725 = vmatprep.subr.mxu0 %v2980_v2  ;;  %3643 = vmatprep.subr.mxu1 %v2913_v3 }
  0x37   : > { %3726 = vmatpush3.msra.mxu0 %v2980_v2  ;;  %3644 = vmatpush3.msra.mxu1 %v2913_v3  ;;  %v2950_v2 = vld [vmem:[%s5863_s3 + $0x1e0] sm:$0xff]  ;;  %v3032_v3 = vld [vmem:[%s5863_s3 + $0x470] sm:$0xff] }
  0x38   : > { %485 = vmatmul.mubr.f32.gmra.mxu0 %v311_v63  ;;  %3727 = vmatprep.subr.mxu0 %v2979_v5 }
  0x39   : > { %489 = vmatprep.mubr.f32.mxu0 %v315_v1  ;;  %3728 = vmatpush3.msra.mxu0 %v2979_v5 }
  0x3a   : > { %3645 = vmatprep.subr.mxu1 %v2912_v16  ;;  %3729 = vmatprep.subr.mxu0 %v2978_v17 }
  0x3b   : > { %3646 = vmatpush3.msra.mxu1 %v2912_v16  ;;  %3730 = vmatpush3.msra.mxu0 %v2978_v17  ;;  %v3030_v16 = vld [vmem:[%s5863_s3 + $0x460] sm:$0xff] }
  0x3c   : > { %490 = vmatmul.mubr.f32.gmra.mxu0 %v314_v4  ;;  %3647 = vmatprep.subr.mxu1 %v2911_v18 }
  0x3d   : > { %494 = vmatprep.mubr.f32.mxu0 %v318_v6  ;;  %3731 = vmatprep.subr.mxu0 %v2977_v19 }
  0x3e   : > { %3648 = vmatpush3.msra.mxu1 %v2911_v18  ;;  %3732 = vmatpush3.msra.mxu0 %v2977_v19  ;;  %v2947_v19 = vld [vmem:[%s5863_s3 + $0x1c8] sm:$0xff] }
  0x3f   : > { %3649 = vmatprep.subr.mxu1 %v2910_v20  ;;  %3733 = vmatprep.subr.mxu0 %v2976_v21 }
  0x40   : > { %495 = vmatmul.mubr.f32.gmra.mxu0 %v317_v7  ;;  %3650 = vmatpush3.msra.mxu1 %v2910_v20 }
  0x41   : > { %499 = vmatprep.mubr.f32.mxu0 %v321_v8  ;;  %3734 = vmatpush3.msra.mxu0 %v2976_v21  ;;  %v2949_v8 = vld [vmem:[%s5863_s3 + $0x1d8] sm:$0xff] }
  0x42   : > { %3651 = vmatprep.subr.mxu1 %v2909_v22  ;;  %3735 = vmatprep.subr.mxu0 %v2975_v23 }
  0x43   : > { %3652 = vmatpush3.msra.mxu1 %v2909_v22  ;;  %3736 = vmatpush3.msra.mxu0 %v2975_v23  ;;  %v3029_v23 = vld [vmem:[%s5863_s3 + $0x458] sm:$0xff] }
  0x44   : > { %500 = vmatmul.mubr.f32.gmra.mxu0 %v320_v9  ;;  %3653 = vmatprep.subr.mxu1 %v2908_v24 }
  0x45   : > { %504 = vmatprep.mubr.f32.mxu0 %v324_v10  ;;  %3737 = vmatprep.subr.mxu0 %v2974_v25 }
  0x46   : > { %3654 = vmatpush3.msra.mxu1 %v2908_v24  ;;  %3738 = vmatpush3.msra.mxu0 %v2974_v25 }
  0x47   : > { %3655 = vmatprep.subr.mxu1 %v2907_v26  ;;  %3739 = vmatprep.subr.mxu0 %v2973_v27 }
  0x48   : > { %505 = vmatmul.mubr.f32.gmra.mxu0 %v323_v11  ;;  %3656 = vmatpush3.msra.mxu1 %v2907_v26  ;;  %v3031_v11 = vld [vmem:[%s5863_s3 + $0x468] sm:$0xff]  ;;  %v2946_v26 = vld [vmem:[%s5863_s3 + $0x1c0] sm:$0xff] }
  0x49   : > { %509 = vmatprep.mubr.f32.mxu0 %v327_v12  ;;  %3740 = vmatpush3.msra.mxu0 %v2973_v27 }
  0x4a   : > { %3657 = vmatprep.subr.mxu1 %v2906_v28  ;;  %3741 = vmatprep.subr.mxu0 %v2972_v29 }
  0x4b   : > { %3658 = vmatpush3.msra.mxu1 %v2906_v28  ;;  %3742 = vmatpush3.msra.mxu0 %v2972_v29  ;;  %v3028_v28 = vld [vmem:[%s5863_s3 + $0x450] sm:$0xff] }
  0x4c   : > { %510 = vmatmul.mubr.f32.gmra.mxu0 %v326_v13  ;;  %3671 = vmatprep.subr.mxu1 %v2953_v30 }
  0x4d   : > { %514 = vmatprep.mubr.f32.mxu0 %v330_v14  ;;  %3743 = vmatprep.subr.mxu0 %v2971_v31 }
  0x4e   : > { %3744 = vmatpush3.msra.mxu0 %v2971_v31 }
  0x4f   : > { %3745 = vmatprep.subr.mxu0 %v2970_v32 }
  0x50   : > { %515 = vmatmul.mubr.f32.gmra.mxu0 %v329_v15  ;;  %v2948_v15 = vld [vmem:[%s5863_s3 + $0x1d0] sm:$0xff] }
  0x51   : > { %3746 = vmatpush3.msra.mxu0 %v2970_v32 }
  0x52   : > { %3803 = vmatprep.subr.mxu0 %v3033_v33 }
  0xd7   : > { %v3614_v35 = vpop.f32.mrf.mxu1 }
  0xd9   : > { %v586_v40 = vpop.f32.mrf.mxu1 }
  0xdb   : > { %v3617_v46 = vpop.f32.mrf.mxu1 }
  0xdd   : > { %v596_v53 = vpop.f32.mrf.mxu1 }
  0xdf   : > { %v3620_v62 = vpop.f32.mrf.mxu1 }
  0xe1   : > { %v606_v7 = vpop.f32.mrf.mxu1 }
  0xe3   : > { %v3623_v20 = vpop.f32.mrf.mxu1 }
  0xec   : > { %v3199_v34 = vpop.f32.mrf.mxu0 }
  0xee   : > { %v3200_v36 = vpop.f32.mrf.mxu0 }
  0xef   : > { %v3201_v38 = vadd.f32 %v3200_v36, %v3199_v34 }
  0xf0   : > { %v3202_v39 = vpop.f32.mrf.mxu0 }
  0xf1   : > { %v472_v41 = vadd.f32 %v3201_v38, %v4674_v37 }
  0xf2   : > { %v3203_v42 = vpop.f32.mrf.mxu0 }
  0xf3   : > { %v3204_v43 = vadd.f32 %v3203_v42, %v3202_v39  ;;  %v587_v44 = vadd.f32 %v586_v40, %v472_v41  ;;  %v2944_v40 = vld [vmem:[%s5863_s3 + $0x1b0] sm:$0xff]  ;;  %v3026_v41 = vld [vmem:[%s5863_s3 + $0x440] sm:$0xff] }
  0xf4   : > { %v3205_v45 = vpop.f32.mrf.mxu0 }
  0xf5   : > { %v477_v47 = vadd.f32 %v3204_v43, %v4674_v37  ;;  %v4678_v48 = vmax.f32 %v587_v44, 0.0  ;;  %v2943_v44 = vld [vmem:[%s5863_s3 + $0x1a8] sm:$0xff] }
  0xf6   : > { %v3206_v49 = vpop.f32.mrf.mxu0 }
  0xf7   : > { %v592_v50 = vadd.f32 %v3614_v35, %v477_v47  ;;  %v3207_v51 = vadd.f32 %v3206_v49, %v3205_v45  ;;  %3659 = vmatprep.mubr.f32.mxu1 %v4678_v48  ;;  %v3027_v35 = vld [vmem:[%s5863_s3 + $0x448] sm:$0xff]  ;;  %v3025_v49 = vld [vmem:[%s5863_s3 + $0x438] sm:$0xff] }
  0xf8   : > { %v3208_v52 = vpop.f32.mrf.mxu0 }
  0xf9   : > { %v4681_v54 = vmax.f32 %v592_v50, 0.0  ;;  %v482_v55 = vadd.f32 %v3207_v51, %v4674_v37  ;;  %v2942_v50 = vld [vmem:[%s5863_s3 + $0x1a0] sm:$0xff] }
  0xfa   : > { %v3209_v56 = vpop.f32.mrf.mxu0 }
  0xfb   : > { %v3210_v58 = vadd.f32 %v3209_v56, %v3208_v52  ;;  %v597_v59 = vadd.f32 %v596_v53, %v482_v55  ;;  %3660 = vmatmul.mubr.f32.vlgmr.msra.gmra.mxu1 %v4681_v54  ;;  %3747 = vmatprep.mubr.f32.mxu0 %v4681_v54  ;;  %v3024_v52 = vld [vmem:[%s5863_s3 + $0x430] sm:$0xff]  ;;  %v2941_v56 = vld [vmem:[%s5863_s3 + $0x198] sm:$0xff] }
  0xfc   : > { %3672 = vmatpush3.msra.mxu1 %v2953_v30  ;;  %v3211_v60 = vpop.f32.mrf.mxu0  ;;  %v616_v30 = vpop.f32.mrf.mxu1 }
  0xfd   : > { %v487_v63 = vadd.f32 %v3210_v58, %v4674_v37  ;;  %v4693_v0 = vmax.f32 %v597_v59, 0.0  ;;  %3673 = vmatprep.subr.mxu1 %v2952_v57  ;;  %v2940_v59 = vld [vmem:[%s5863_s3 + $0x190] sm:$0xff] }
  0xfe   : > { %3674 = vmatpush3.msra.mxu1 %v2952_v57  ;;  %v3212_v1 = vpop.f32.mrf.mxu0  ;;  %v4757_v45 = vpop.f32.mrf.mxu1  ;;  %v3023_v57 = vld [vmem:[%s5863_s3 + $0x428] sm:$0xff] }
  0xff   : > { %v602_v4 = vadd.f32 %v3617_v46, %v487_v63  ;;  %v3213_v5 = vadd.f32 %v3212_v1, %v3211_v60  ;;  %3675 = vmatprep.subr.mxu1 %v2951_v61  ;;  %3748 = vmatmul.mubr.f32.vlgmr.msra.gmra.mxu0 %v4693_v0  ;;  %v3022_v60 = vld [vmem:[%s5863_s3 + $0x420] sm:$0xff]  ;;  %v3021_v63 = vld [vmem:[%s5863_s3 + $0x418] sm:$0xff] }
 0x100   : > { %3676 = vmatpush3.msra.mxu1 %v2951_v61  ;;  %3804 = vmatpush3.msra.mxu0 %v3033_v33  ;;  %v3214_v6 = vpop.f32.mrf.mxu0  ;;  %v2945_v33 = vld [vmem:[%s5863_s3 + $0x1b8] sm:$0xff]  ;;  %v626_v53 = vpop.f32.mrf.mxu1  ;;  %v2938_v1 = vld [vmem:[%s5863_s3 + $0x180] sm:$0xff] }
 0x101   : > { %v4705_v9 = vmax.f32 %v602_v4, 0.0  ;;  %3677 = vmatprep.subr.mxu1 %v2950_v2  ;;  %3805 = vmatprep.subr.mxu0 %v3032_v3  ;;  %v492_v10 = vadd.f32 %v3213_v5, %v4674_v37  ;;  %v3019_v4 = vld [vmem:[%s5863_s3 + $0x408] sm:$0xff]  ;;  %v3016_v5 = vld [vmem:[%s5863_s3 + $0x3f0] sm:$0xff] }
 0x102   : > { %3662 = vmatprep.mubr.f32.mxu1 %v4693_v0  ;;  %3678 = vmatpush3.msra.mxu1 %v2950_v2  ;;  %v3215_v12 = vpop.f32.mrf.mxu0  ;;  %v3020_v2 = vld [vmem:[%s5863_s3 + $0x410] sm:$0xff] }
 0x103   : > { %3806 = vmatpush3.msra.mxu0 %v3032_v3  ;;  %v3216_v13 = vadd.f32 %v3215_v12, %v3214_v6  ;;  %v607_v14 = vadd.f32 %v606_v7, %v492_v10  ;;  %3679 = vmatprep.subr.mxu1 %v2949_v8  ;;  %v3017_v3 = vld [vmem:[%s5863_s3 + $0x3f8] sm:$0xff]  ;;  %v3018_v6 = vld [vmem:[%s5863_s3 + $0x400] sm:$0xff] }
 0x104   : > { %3807 = vmatprep.subr.mxu0 %v3031_v11  ;;  %3663 = vmatmul.mubr.f32.gmra.mxu1 %v4705_v9  ;;  %v3217_v17 = vpop.f32.mrf.mxu0  ;;  %v2937_v10 = vld [vmem:[%s5863_s3 + $0x178] sm:$0xff]  ;;  %v3014_v12 = vld [vmem:[%s5863_s3 + $0x3e0] sm:$0xff] }
 0x105   : > { %v497_v18 = vadd.f32 %v3216_v13, %v4674_v37  ;;  %3680 = vmatpush3.msra.mxu1 %v2949_v8  ;;  %3808 = vmatpush3.msra.mxu0 %v3031_v11  ;;  %v4723_v21 = vmax.f32 %v607_v14, 0.0  ;;  %v3015_v8 = vld [vmem:[%s5863_s3 + $0x3e8] sm:$0xff]  ;;  %v2936_v13 = vld [vmem:[%s5863_s3 + $0x170] sm:$0xff] }
 0x106   : > { %3681 = vmatprep.subr.mxu1 %v2948_v15  ;;  %3809 = vmatprep.subr.mxu0 %v3030_v16  ;;  %v3218_v22 = vpop.f32.mrf.mxu0 }
 0x107   : > { %v612_v24 = vadd.f32 %v3620_v62, %v497_v18  ;;  %3682 = vmatpush3.msra.mxu1 %v2948_v15  ;;  %3750 = vmatprep.mubr.f32.mxu0 %v4705_v9  ;;  %v3219_v25 = vadd.f32 %v3218_v22, %v3217_v17  ;;  %v2939_v62 = vld [vmem:[%s5863_s3 + $0x188] sm:$0xff]  ;;  %v3013_v15 = vld [vmem:[%s5863_s3 + $0x3d8] sm:$0xff]  ;;  %v3012_v18 = vld [vmem:[%s5863_s3 + $0x3d0] sm:$0xff] }
 0x108   : > { %3810 = vmatpush3.msra.mxu0 %v3030_v16  ;;  %3683 = vmatprep.subr.mxu1 %v2947_v19  ;;  %v3220_v27 = vpop.f32.mrf.mxu0  ;;  %v2935_v16 = vld [vmem:[%s5863_s3 + $0x168] sm:$0xff] }
 0x109   : > { %3811 = vmatprep.subr.mxu0 %v3029_v23  ;;  %3684 = vmatpush3.msra.mxu1 %v2947_v19  ;;  %v502_v29 = vadd.f32 %v3219_v25, %v4674_v37  ;;  %v4736_v31 = vmax.f32 %v612_v24, 0.0  ;;  %v2934_v19 = vld [vmem:[%s5863_s3 + $0x160] sm:$0xff]  ;;  %v2932_v24 = vld [vmem:[%s5863_s3 + $0x150] sm:$0xff] }
 0x10a   : > { %3751 = vmatmul.mubr.f32.gmra.mxu0 %v4723_v21  ;;  %3685 = vmatprep.subr.mxu1 %v2946_v26  ;;  %v3221_v32 = vpop.f32.mrf.mxu0 }
 0x10b   : > { %3812 = vmatpush3.msra.mxu0 %v3029_v23  ;;  %3665 = vmatprep.mubr.f32.mxu1 %v4723_v21  ;;  %v3222_v34 = vadd.f32 %v3221_v32, %v3220_v27  ;;  %v617_v36 = vadd.f32 %v616_v30, %v502_v29  ;;  %v3010_v23 = vld [vmem:[%s5863_s3 + $0x3c0] sm:$0xff]  ;;  %v2931_v27 = vld [vmem:[%s5863_s3 + $0x148] sm:$0xff]  ;;  %v2929_v32 = vld [vmem:[%s5863_s3 + $0x138] sm:$0xff] }
 0x10c   : > { %3813 = vmatprep.subr.mxu0 %v3028_v28  ;;  %3686 = vmatpush3.msra.mxu1 %v2946_v26  ;;  %v3223_v38 = vpop.f32.mrf.mxu0  ;;  %v3009_v26 = vld [vmem:[%s5863_s3 + $0x3b8] sm:$0xff]  ;;  %v2930_v29 = vld [vmem:[%s5863_s3 + $0x140] sm:$0xff]  ;;  %v3007_v30 = vld [vmem:[%s5863_s3 + $0x3a8] sm:$0xff] }
 0x10d   : > { %3814 = vmatpush3.msra.mxu0 %v3028_v28  ;;  %v507_v39 = vadd.f32 %v3222_v34, %v4674_v37  ;;  %3687 = vmatprep.subr.mxu1 %v2945_v33  ;;  %v4759_v47 = vmax.f32 %v617_v36, 0.0  ;;  %v3008_v28 = vld [vmem:[%s5863_s3 + $0x3b0] sm:$0xff]  ;;  %v2927_v36 = vld [vmem:[%s5863_s3 + $0x128] sm:$0xff] }
 0x10e   : > { %3815 = vmatprep.subr.mxu0 %v3027_v35  ;;  %3666 = vmatmul.mubr.f32.gmra.mxu1 %v4736_v31  ;;  %v3224_v42 = vpop.f32.mrf.mxu0  ;;  %v2928_v34 = vld [vmem:[%s5863_s3 + $0x130] sm:$0xff] }
 0x10f   : > { %3688 = vmatpush3.msra.mxu1 %v2945_v33  ;;  %3816 = vmatpush3.msra.mxu0 %v3027_v35  ;;  %v3225_v43 = vadd.f32 %v3224_v42, %v3223_v38  ;;  %v622_v46 = vadd.f32 %v3623_v20, %v507_v39  ;;  %v2933_v20 = vld [vmem:[%s5863_s3 + $0x158] sm:$0xff]  ;;  %v3006_v33 = vld [vmem:[%s5863_s3 + $0x3a0] sm:$0xff]  ;;  %v3004_v38 = vld [vmem:[%s5863_s3 + $0x390] sm:$0xff] }
 0x110   : > { %3689 = vmatprep.subr.mxu1 %v2944_v40  ;;  %3817 = vmatprep.subr.mxu0 %v3026_v41  ;;  %v3226_v7 = vpop.f32.mrf.mxu0  ;;  %v3005_v35 = vld [vmem:[%s5863_s3 + $0x398] sm:$0xff]  ;;  %v2926_v39 = vld [vmem:[%s5863_s3 + $0x120] sm:$0xff] }
 0x111   : > { %3690 = vmatpush3.msra.mxu1 %v2944_v40  ;;  %3753 = vmatprep.mubr.f32.mxu0 %v4736_v31  ;;  %v512_v51 = vadd.f32 %v3225_v43, %v4674_v37  ;;  %v4772_v55 = vmax.f32 %v622_v46, 0.0  ;;  %v3003_v40 = vld [vmem:[%s5863_s3 + $0x388] sm:$0xff]  ;;  %v3002_v42 = vld [vmem:[%s5863_s3 + $0x380] sm:$0xff]  ;;  %v2924_v43 = vld [vmem:[%s5863_s3 + $0x110] sm:$0xff] }
 0x112   : > { %3818 = vmatpush3.msra.mxu0 %v3026_v41  ;;  %3691 = vmatprep.subr.mxu1 %v2943_v44  ;;  %v3227_v11 = vpop.f32.mrf.mxu0  ;;  %v2925_v41 = vld [vmem:[%s5863_s3 + $0x118] sm:$0xff]  ;;  %v659_v46 = vld [vmem:[%s5863_s3 + $0x70] sm:$0xff] }
 0x113   : > { %3819 = vmatprep.subr.mxu0 %v3025_v49  ;;  %3692 = vmatpush3.msra.mxu1 %v2943_v44  ;;  %v627_v58 = vadd.f32 %v626_v53, %v512_v51  ;;  %v3228_v14 = vadd.f32 %v3227_v11, %v3226_v7  ;;  %v660_v44 = vld [vmem:[%s5863_s3 + $0x78] sm:$0xff]  ;;  %v3000_v53 = vld [vmem:[%s5863_s3 + $0x370] sm:$0xff]  ;;  %v649_v7 = vld [vmem:[%s5863_s3 + $0x20] sm:$0xff] }
 0x114   : > { %3754 = vmatmul.mubr.f32.gmra.mxu0 %v4759_v47  ;;  %3693 = vmatprep.subr.mxu1 %v2942_v50  ;;  %v3001_v51 = vld [vmem:[%s5863_s3 + $0x378] sm:$0xff]  ;;  %v2991_v11 = vld [vmem:[%s5863_s3 + $0x328] sm:$0xff] }
 0x115   : > { %3820 = vmatpush3.msra.mxu0 %v3025_v49  ;;  %3668 = vmatprep.mubr.f32.mxu1 %v4759_v47  ;;  %v4789_v61 = vmax.f32 %v627_v58, 0.0  ;;  %v517_v17 = vadd.f32 %v3228_v14, %v4674_v37  ;;  %v3011_v37 = vld [vmem:[%s5863_s3 + $0x3c8] sm:$0xff]  ;;  %v2922_v49 = vld [vmem:[%s5863_s3 + $0x100] sm:$0xff]  ;;  %v655_v58 = vld [vmem:[%s5863_s3 + $0x50] sm:$0xff] }
 0x116   : > { %3821 = vmatprep.subr.mxu0 %v3024_v52  ;;  %3694 = vmatpush3.msra.mxu1 %v2942_v50  ;;  %v658_v50 = vld [vmem:[%s5863_s3 + $0x68] sm:$0xff] }
 0x117   : > { %3822 = vmatpush3.msra.mxu0 %v3024_v52  ;;  %3695 = vmatprep.subr.mxu1 %v2941_v56  ;;  %v632_v22 = vadd.f32 %v4757_v45, %v517_v17  ;;  %v2923_v45 = vld [vmem:[%s5863_s3 + $0x108] sm:$0xff]  ;;  %v657_v52 = vld [vmem:[%s5863_s3 + $0x60] sm:$0xff]  ;;  %v2988_v17 = vld [vmem:[%s5863_s3 + $0x310] sm:$0xff] }
 0x118   : > { %3823 = vmatprep.subr.mxu0 %v3023_v57  ;;  %3669 = vmatmul.mubr.f32.gmra.mxu1 %v4772_v55  ;;  %v646_v14 = vld [vmem:[%s5863_s3 + $0x8] sm:$0xff] }
 0x119   : > { %3696 = vmatpush3.msra.mxu1 %v2941_v56  ;;  %3824 = vmatpush3.msra.mxu0 %v3023_v57  ;;  %v4870_v25 = vmax.f32 %v632_v22, 0.0  ;;  %v656_v56 = vld [vmem:[%s5863_s3 + $0x58] sm:$0xff]  ;;  %v2999_v57 = vld [vmem:[%s5863_s3 + $0x368] sm:$0xff] }
 0x11a   : > { %3697 = vmatprep.subr.mxu1 %v2940_v59  ;;  %3703 = vmatprep.mubr.f32.mxu1 %v4681_v54  ;;  %v2967_v22 = vld [vmem:[%s5863_s3 + $0x268] sm:$0xff] }
 0x11b   : > { %3756 = vmatprep.mubr.f32.mxu0 %v4772_v55  ;;  %3825 = vmatprep.subr.mxu0 %v3022_v60 }
 0x11c   : > { %3698 = vmatpush3.msra.mxu1 %v2940_v59  ;;  %3826 = vmatpush3.msra.mxu0 %v3022_v60  ;;  %v2998_v59 = vld [vmem:[%s5863_s3 + $0x360] sm:$0xff]  ;;  %v654_v60 = vld [vmem:[%s5863_s3 + $0x48] sm:$0xff] }
 0x11d   : > { %3699 = vmatprep.subr.mxu1 %v2939_v62  ;;  %3827 = vmatprep.subr.mxu0 %v3021_v63 }
 0x11e   : > { %3700 = vmatpush3.msra.mxu1 %v2939_v62  ;;  %3757 = vmatmul.mubr.f32.gmra.mxu0 %v4789_v61  ;;  %v2997_v62 = vld [vmem:[%s5863_s3 + $0x358] sm:$0xff] }
 0x11f   : > { %3828 = vmatpush3.msra.mxu0 %v3021_v63  ;;  %3701 = vmatprep.subr.mxu1 %v2938_v1  ;;  %v653_v63 = vld [vmem:[%s5863_s3 + $0x40] sm:$0xff] }
 0x120   : > { %3829 = vmatprep.subr.mxu0 %v3020_v2  ;;  %3835 = vmatprep.mubr.f32.mxu0 %v4693_v0 }
 0x121   : > { %3702 = vmatpush3.msra.mxu1 %v2938_v1  ;;  %3830 = vmatpush3.msra.mxu0 %v3020_v2  ;;  %v2996_v1 = vld [vmem:[%s5863_s3 + $0x350] sm:$0xff]  ;;  %v652_v2 = vld [vmem:[%s5863_s3 + $0x38] sm:$0xff] }
 0x122   : > { %3704 = vmatmul.mubr.f32.vlgmr.msra.gmra.mxu1 %v4693_v0  ;;  %3759 = vmatprep.subr.mxu1 %v3017_v3 }
 0x123   : > { %3831 = vmatprep.subr.mxu0 %v3019_v4  ;;  %3706 = vmatprep.mubr.f32.mxu1 %v4705_v9 }
 0x124   : > { %3760 = vmatpush3.msra.mxu1 %v3017_v3  ;;  %3832 = vmatpush3.msra.mxu0 %v3019_v4  ;;  %v2995_v3 = vld [vmem:[%s5863_s3 + $0x348] sm:$0xff]  ;;  %v2994_v4 = vld [vmem:[%s5863_s3 + $0x340] sm:$0xff] }
 0x125   : > { %3761 = vmatprep.subr.mxu1 %v3016_v5  ;;  %3833 = vmatprep.subr.mxu0 %v3018_v6 }
 0x126   : > { %3762 = vmatpush3.msra.mxu1 %v3016_v5  ;;  %3834 = vmatpush3.msra.mxu0 %v3018_v6  ;;  %v650_v5 = vld [vmem:[%s5863_s3 + $0x28] sm:$0xff]  ;;  %v2993_v6 = vld [vmem:[%s5863_s3 + $0x338] sm:$0xff] }
 0x127   : > { %3707 = vmatmul.mubr.f32.gmra.mxu1 %v4723_v21  ;;  %3763 = vmatprep.subr.mxu1 %v3015_v8 }
 0x128   : > { %3836 = vmatmul.mubr.f32.vlgmr.msra.gmra.mxu0 %v4705_v9  ;;  %3891 = vmatprep.subr.mxu0 %v2937_v10 }
 0x129   : > { %3709 = vmatprep.mubr.f32.mxu1 %v4736_v31  ;;  %3764 = vmatpush3.msra.mxu1 %v3015_v8  ;;  %v2992_v8 = vld [vmem:[%s5863_s3 + $0x330] sm:$0xff] }
 0x12a   : > { %3838 = vmatprep.mubr.f32.mxu0 %v4723_v21  ;;  %3892 = vmatpush3.msra.mxu0 %v2937_v10  ;;  %v648_v10 = vld [vmem:[%s5863_s3 + $0x18] sm:$0xff] }
 0x12b   : > { %3765 = vmatprep.subr.mxu1 %v3014_v12  ;;  %3893 = vmatprep.subr.mxu0 %v2936_v13 }
 0x12c   : > { %3766 = vmatpush3.msra.mxu1 %v3014_v12  ;;  %3894 = vmatpush3.msra.mxu0 %v2936_v13  ;;  %v647_v12 = vld [vmem:[%s5863_s3 + $0x10] sm:$0xff]  ;;  %v2990_v13 = vld [vmem:[%s5863_s3 + $0x320] sm:$0xff] }
 0x12d   : > { %3710 = vmatmul.mubr.f32.gmra.mxu1 %v4759_v47  ;;  %3767 = vmatprep.subr.mxu1 %v3013_v15 }
 0x12e   : > { %3839 = vmatmul.mubr.f32.gmra.mxu0 %v4736_v31  ;;  %3895 = vmatprep.subr.mxu0 %v2935_v16 }
 0x12f   : > { %3712 = vmatprep.mubr.f32.mxu1 %v4772_v55  ;;  %3768 = vmatpush3.msra.mxu1 %v3013_v15  ;;  %v2989_v15 = vld [vmem:[%s5863_s3 + $0x318] sm:$0xff] }
 0x130   : > { %3841 = vmatprep.mubr.f32.mxu0 %v4759_v47  ;;  %3896 = vmatpush3.msra.mxu0 %v2935_v16  ;;  %v645_v16 = vld [vmem:[%s5863_s3] sm:$0xff] }
 0x131   : > { %3769 = vmatprep.subr.mxu1 %v3012_v18  ;;  %3897 = vmatprep.subr.mxu0 %v2934_v19 }
 0x132   : > { %3770 = vmatpush3.msra.mxu1 %v3012_v18  ;;  %3898 = vmatpush3.msra.mxu0 %v2934_v19  ;;  %v2969_v18 = vld [vmem:[%s5863_s3 + $0x278] sm:$0xff]  ;;  %v2987_v19 = vld [vmem:[%s5863_s3 + $0x308] sm:$0xff] }
 0x133   : > { %3713 = vmatmul.mubr.f32.gmra.mxu1 %v4789_v61  ;;  %3771 = vmatprep.subr.mxu1 %v3011_v37 }
 0x134   : > { %3842 = vmatmul.mubr.f32.gmra.mxu0 %v4772_v55  ;;  %3899 = vmatprep.subr.mxu0 %v2933_v20 }
 0x135   : > { %3772 = vmatpush3.msra.mxu1 %v3011_v37  ;;  %3791 = vmatprep.mubr.f32.mxu1 %v4693_v0  ;;  %v2968_v37 = vld [vmem:[%s5863_s3 + $0x270] sm:$0xff] }
 0x136   : > { %3900 = vmatpush3.msra.mxu0 %v2933_v20  ;;  %3773 = vmatprep.subr.mxu1 %v3010_v23  ;;  %v2986_v20 = vld [vmem:[%s5863_s3 + $0x300] sm:$0xff] }
 0x137   : > { %3901 = vmatprep.subr.mxu0 %v2932_v24  ;;  %3774 = vmatpush3.msra.mxu1 %v3010_v23  ;;  %v2966_v23 = vld [vmem:[%s5863_s3 + $0x260] sm:$0xff] }
 0x138   : > { %3844 = vmatprep.mubr.f32.mxu0 %v4789_v61  ;;  %3902 = vmatpush3.msra.mxu0 %v2932_v24  ;;  %v2965_v24 = vld [vmem:[%s5863_s3 + $0x258] sm:$0xff] }
 0x139   : > { %3775 = vmatprep.subr.mxu1 %v3009_v26  ;;  %3845 = vmatmul.mubr.f32.gmra.mxu0 %v4870_v25 }
 0x13a   : > { %3903 = vmatprep.subr.mxu0 %v2931_v27  ;;  %3776 = vmatpush3.msra.mxu1 %v3009_v26  ;;  %v2964_v26 = vld [vmem:[%s5863_s3 + $0x250] sm:$0xff] }
 0x13b   : > { %3904 = vmatpush3.msra.mxu0 %v2931_v27  ;;  %3923 = vmatprep.mubr.f32.mxu0 %v4678_v48  ;;  %v2963_v27 = vld [vmem:[%s5863_s3 + $0x248] sm:$0xff] }
 0x13c   : > { %3777 = vmatprep.subr.mxu1 %v3008_v28  ;;  %3905 = vmatprep.subr.mxu0 %v2930_v29 }
 0x13d   : > { %3778 = vmatpush3.msra.mxu1 %v3008_v28  ;;  %3906 = vmatpush3.msra.mxu0 %v2930_v29  ;;  %v2962_v28 = vld [vmem:[%s5863_s3 + $0x240] sm:$0xff]  ;;  %v2961_v29 = vld [vmem:[%s5863_s3 + $0x238] sm:$0xff] }
 0x13e   : > { %3779 = vmatprep.subr.mxu1 %v3007_v30  ;;  %3907 = vmatprep.subr.mxu0 %v2929_v32 }
 0x13f   : > { %3780 = vmatpush3.msra.mxu1 %v3007_v30  ;;  %3908 = vmatpush3.msra.mxu0 %v2929_v32  ;;  %v2960_v30 = vld [vmem:[%s5863_s3 + $0x230] sm:$0xff]  ;;  %v2958_v32 = vld [vmem:[%s5863_s3 + $0x220] sm:$0xff] }
 0x140   : > { %3781 = vmatprep.subr.mxu1 %v3006_v33  ;;  %3909 = vmatprep.subr.mxu0 %v2928_v34 }
 0x141   : > { %3782 = vmatpush3.msra.mxu1 %v3006_v33  ;;  %3910 = vmatpush3.msra.mxu0 %v2928_v34  ;;  %v2957_v33 = vld [vmem:[%s5863_s3 + $0x218] sm:$0xff]  ;;  %v2955_v34 = vld [vmem:[%s5863_s3 + $0x208] sm:$0xff] }
 0x142   : > { %3783 = vmatprep.subr.mxu1 %v3005_v35  ;;  %3911 = vmatprep.subr.mxu0 %v2927_v36 }
 0x143   : > { %3784 = vmatpush3.msra.mxu1 %v3005_v35  ;;  %3912 = vmatpush3.msra.mxu0 %v2927_v36  ;;  %v2954_v35 = vld [vmem:[%s5863_s3 + $0x200] sm:$0xff]  ;;  %v5868_v36 = vmov 0.0  }
 0x144   : > { %3785 = vmatprep.subr.mxu1 %v3004_v38  ;;  %3913 = vmatprep.subr.mxu0 %v2926_v39 }
 0x145   : > { %3786 = vmatpush3.msra.mxu1 %v3004_v38  ;;  %3914 = vmatpush3.msra.mxu0 %v2926_v39  ;;  %v3050_v38 = vld [vmem:[%s5864_s4 + $0xf8] sm:$0xff]  ;;  %v3045_v39 = vld [vmem:[%s5864_s4 + $0xd0] sm:$0xff] }
 0x146   : > { %3787 = vmatprep.subr.mxu1 %v3003_v40  ;;  %3915 = vmatprep.subr.mxu0 %v2925_v41 }
 0x147   : > { %3788 = vmatpush3.msra.mxu1 %v3003_v40  ;;  %3916 = vmatpush3.msra.mxu0 %v2925_v41  ;;  %v3079_v40 = vld [vmem:[%s5864_s4 + $0x1e0] sm:$0xff]  ;;  %v3044_v41 = vld [vmem:[%s5864_s4 + $0xc8] sm:$0xff] }
 0x148   : > { %3789 = vmatprep.subr.mxu1 %v3002_v42  ;;  %3917 = vmatprep.subr.mxu0 %v2924_v43 }
 0x149   : > { %3790 = vmatpush3.msra.mxu1 %v3002_v42  ;;  %3918 = vmatpush3.msra.mxu0 %v2924_v43  ;;  %v3078_v42 = vld [vmem:[%s5864_s4 + $0x1d8] sm:$0xff]  ;;  %v3043_v43 = vld [vmem:[%s5864_s4 + $0xc0] sm:$0xff] }
 0x14a   : > { %3792 = vmatmul.mubr.f32.vlgmr.msra.gmra.mxu1 %v4705_v9  ;;  %3847 = vmatprep.subr.mxu1 %v660_v44 }
 0x14b   : > { %3919 = vmatprep.subr.mxu0 %v2923_v45  ;;  %3794 = vmatprep.mubr.f32.mxu1 %v4723_v21 }
 0x14c   : > { %3848 = vmatpush3.msra.mxu1 %v660_v44  ;;  %3920 = vmatpush3.msra.mxu0 %v2923_v45  ;;  %v3077_v44 = vld [vmem:[%s5864_s4 + $0x1d0] sm:$0xff]  ;;  %v3042_v45 = vld [vmem:[%s5864_s4 + $0xb8] sm:$0xff] }
 0x14d   : > { %3849 = vmatprep.subr.mxu1 %v659_v46  ;;  %3921 = vmatprep.subr.mxu0 %v2922_v49 }
 0x14e   : > { %3850 = vmatpush3.msra.mxu1 %v659_v46  ;;  %3922 = vmatpush3.msra.mxu0 %v2922_v49  ;;  %v3076_v46 = vld [vmem:[%s5864_s4 + $0x1c8] sm:$0xff]  ;;  %v3041_v49 = vld [vmem:[%s5864_s4 + $0xb0] sm:$0xff] }
 0x14f   : > { %3795 = vmatmul.mubr.f32.gmra.mxu1 %v4736_v31  ;;  %3851 = vmatprep.subr.mxu1 %v658_v50 }
 0x150   : > { %3924 = vmatmul.mubr.f32.vlgmr.msra.gmra.mxu0 %v4681_v54  ;;  %3979 = vmatprep.subr.mxu0 %v3001_v51 }
 0x151   : > { %3797 = vmatprep.mubr.f32.mxu1 %v4759_v47  ;;  %3852 = vmatpush3.msra.mxu1 %v658_v50  ;;  %v3075_v50 = vld [vmem:[%s5864_s4 + $0x1c0] sm:$0xff] }
 0x152   : > { %3926 = vmatprep.mubr.f32.mxu0 %v4693_v0  ;;  %3980 = vmatpush3.msra.mxu0 %v3001_v51  ;;  %v3040_v51 = vld [vmem:[%s5864_s4 + $0xa8] sm:$0xff] }
 0x153   : > { %3853 = vmatprep.subr.mxu1 %v657_v52  ;;  %3981 = vmatprep.subr.mxu0 %v3000_v53 }
 0x154   : > { %3854 = vmatpush3.msra.mxu1 %v657_v52  ;;  %3982 = vmatpush3.msra.mxu0 %v3000_v53  ;;  %v3074_v52 = vld [vmem:[%s5864_s4 + $0x1b8] sm:$0xff]  ;;  %v3039_v53 = vld [vmem:[%s5864_s4 + $0xa0] sm:$0xff] }
 0x155   : > { %3798 = vmatmul.mubr.f32.gmra.mxu1 %v4772_v55  ;;  %3855 = vmatprep.subr.mxu1 %v656_v56 }
 0x156   : > { %3927 = vmatmul.mubr.f32.gmra.mxu0 %v4705_v9  ;;  %3983 = vmatprep.subr.mxu0 %v2999_v57 }
 0x157   : > { %3800 = vmatprep.mubr.f32.mxu1 %v4789_v61  ;;  %3856 = vmatpush3.msra.mxu1 %v656_v56  ;;  %v3073_v56 = vld [vmem:[%s5864_s4 + $0x1b0] sm:$0xff] }
 0x158   : > { %3929 = vmatprep.mubr.f32.mxu0 %v4723_v21  ;;  %3984 = vmatpush3.msra.mxu0 %v2999_v57 }
 0x159   : > { %3857 = vmatprep.subr.mxu1 %v655_v58  ;;  %3985 = vmatprep.subr.mxu0 %v2998_v59 }
 0x15a   : > { %3858 = vmatpush3.msra.mxu1 %v655_v58  ;;  %3986 = vmatpush3.msra.mxu0 %v2998_v59  ;;  %v3038_v58 = vld [vmem:[%s5864_s4 + $0x98] sm:$0xff]  ;;  %v3072_v59 = vld [vmem:[%s5864_s4 + $0x1a8] sm:$0xff] }
 0x15b   : > { %3801 = vmatmul.mubr.f32.gmra.mxu1 %v4870_v25  ;;  %3859 = vmatprep.subr.mxu1 %v654_v60 }
 0x15c   : > { %3930 = vmatmul.mubr.f32.gmra.mxu0 %v4736_v31  ;;  %3987 = vmatprep.subr.mxu0 %v2997_v62 }
 0x15d   : > { %3860 = vmatpush3.msra.mxu1 %v654_v60  ;;  %3879 = vmatprep.mubr.f32.mxu1 %v4678_v48  ;;  %v651_v48 = vld [vmem:[%s5863_s3 + $0x30] sm:$0xff] }
 0x15e   : > { %3932 = vmatprep.mubr.f32.mxu0 %v4759_v47  ;;  %3988 = vmatpush3.msra.mxu0 %v2997_v62  ;;  %v3037_v60 = vld [vmem:[%s5864_s4 + $0x90] sm:$0xff]  ;;  %v3071_v62 = vld [vmem:[%s5864_s4 + $0x1a0] sm:$0xff] }
 0x15f   : > { %3861 = vmatprep.subr.mxu1 %v653_v63  ;;  %3989 = vmatprep.subr.mxu0 %v2996_v1 }
 0x160   : > { %3862 = vmatpush3.msra.mxu1 %v653_v63  ;;  %3990 = vmatpush3.msra.mxu0 %v2996_v1  ;;  %v3036_v1 = vld [vmem:[%s5864_s4 + $0x88] sm:$0xff] }
 0x161   : > { %3863 = vmatprep.subr.mxu1 %v652_v2  ;;  %3933 = vmatmul.mubr.f32.gmra.mxu0 %v4772_v55 }
 0x162   : > { %3991 = vmatprep.subr.mxu0 %v2995_v3  ;;  %3864 = vmatpush3.msra.mxu1 %v652_v2  ;;  %v3070_v2 = vld [vmem:[%s5864_s4 + $0x198] sm:$0xff] }
 0x163   : > { %3992 = vmatpush3.msra.mxu0 %v2995_v3  ;;  %4011 = vmatprep.mubr.f32.mxu0 %v4693_v0 }
 0x164   : > { %3865 = vmatprep.subr.mxu1 %v651_v48  ;;  %3993 = vmatprep.subr.mxu0 %v2994_v4 }
 0x165   : > { %3866 = vmatpush3.msra.mxu1 %v651_v48  ;;  %3994 = vmatpush3.msra.mxu0 %v2994_v4  ;;  %v3035_v4 = vld [vmem:[%s5864_s4 + $0x80] sm:$0xff] }
 0x166   : > { %3867 = vmatprep.subr.mxu1 %v650_v5  ;;  %3995 = vmatprep.subr.mxu0 %v2993_v6 }
 0x167   : > { %3868 = vmatpush3.msra.mxu1 %v650_v5  ;;  %3996 = vmatpush3.msra.mxu0 %v2993_v6  ;;  %v3069_v5 = vld [vmem:[%s5864_s4 + $0x190] sm:$0xff]  ;;  %v3068_v6 = vld [vmem:[%s5864_s4 + $0x188] sm:$0xff] }
 0x168   : > { %3869 = vmatprep.subr.mxu1 %v649_v7  ;;  %3997 = vmatprep.subr.mxu0 %v2992_v8 }
 0x169   : > { %3870 = vmatpush3.msra.mxu1 %v649_v7  ;;  %3998 = vmatpush3.msra.mxu0 %v2992_v8 }
 0x16a   : > { %3871 = vmatprep.subr.mxu1 %v648_v10  ;;  %3999 = vmatprep.subr.mxu0 %v2991_v11 }
 0x16b   : > { %3872 = vmatpush3.msra.mxu1 %v648_v10  ;;  %4000 = vmatpush3.msra.mxu0 %v2991_v11  ;;  %v3067_v10 = vld [vmem:[%s5864_s4 + $0x180] sm:$0xff] }
 0x16c   : > { %3873 = vmatprep.subr.mxu1 %v647_v12  ;;  %4001 = vmatprep.subr.mxu0 %v2990_v13 }
 0x16d   : > { %3874 = vmatpush3.msra.mxu1 %v647_v12  ;;  %4002 = vmatpush3.msra.mxu0 %v2990_v13 }
 0x16e   : > { %3875 = vmatprep.subr.mxu1 %v646_v14  ;;  %4003 = vmatprep.subr.mxu0 %v2989_v15 }
 0x16f   : > { %3876 = vmatpush3.msra.mxu1 %v646_v14  ;;  %4004 = vmatpush3.msra.mxu0 %v2989_v15 }
 0x170   : > { %3877 = vmatprep.subr.mxu1 %v645_v16  ;;  %4005 = vmatprep.subr.mxu0 %v2988_v17 }
 0x171   : > { %3878 = vmatpush3.msra.mxu1 %v645_v16  ;;  %4006 = vmatpush3.msra.mxu0 %v2988_v17 }
 0x172   : > { %3880 = vmatmul.mubr.f32.vlgmr.msra.gmra.mxu1 %v4681_v54  ;;  %3935 = vmatprep.subr.mxu1 %v2969_v18 }
 0x173   : > { %4007 = vmatprep.subr.mxu0 %v2987_v19  ;;  %3882 = vmatprep.mubr.f32.mxu1 %v4693_v0 }
 0x174   : > { %3936 = vmatpush3.msra.mxu1 %v2969_v18  ;;  %4008 = vmatpush3.msra.mxu0 %v2987_v19 }
 0x175   : > { %3937 = vmatprep.subr.mxu1 %v2968_v37  ;;  %4009 = vmatprep.subr.mxu0 %v2986_v20 }
 0x176   : > { %3938 = vmatpush3.msra.mxu1 %v2968_v37  ;;  %4010 = vmatpush3.msra.mxu0 %v2986_v20 }
 0x177   : > { %3883 = vmatmul.mubr.f32.gmra.mxu1 %v4705_v9  ;;  %3939 = vmatprep.subr.mxu1 %v2967_v22 }
 0x178   : > { %4012 = vmatmul.mubr.f32.vlgmr.msra.gmra.mxu0 %v4705_v9  ;;  %3885 = vmatprep.mubr.f32.mxu1 %v4723_v21 }
 0x179   : > { %3940 = vmatpush3.msra.mxu1 %v2967_v22  ;;  %4014 = vmatprep.mubr.f32.mxu0 %v4723_v21 }
 0x17a   : > { %3941 = vmatprep.subr.mxu1 %v2966_v23  ;;  %4058 = vmatprep.subr.mxu0 %v5868_v36 }
 0x17b   : > { %3942 = vmatpush3.msra.mxu1 %v2966_v23 }
 0x17c   : > { %3886 = vmatmul.mubr.f32.gmra.mxu1 %v4736_v31  ;;  %3943 = vmatprep.subr.mxu1 %v2965_v24 }
 0x17d   : > { %4015 = vmatmul.mubr.f32.gmra.mxu0 %v4736_v31  ;;  %3888 = vmatprep.mubr.f32.mxu1 %v4759_v47 }
 0x17e   : > { %3944 = vmatpush3.msra.mxu1 %v2965_v24  ;;  %4017 = vmatprep.mubr.f32.mxu0 %v4759_v47 }
 0x17f   : > { %3945 = vmatprep.subr.mxu1 %v2964_v26 }
 0x180   : > { %3946 = vmatpush3.msra.mxu1 %v2964_v26 }
 0x181   : > { %3889 = vmatmul.mubr.f32.gmra.mxu1 %v4772_v55  ;;  %3947 = vmatprep.subr.mxu1 %v2963_v27 }
 0x182   : > { %4018 = vmatmul.mubr.f32.gmra.mxu0 %v4772_v55  ;;  %3948 = vmatpush3.msra.mxu1 %v2963_v27 }
 0x183   : > { %3967 = vmatprep.mubr.f32.mxu1 %v4681_v54  ;;  %4020 = vmatprep.mubr.f32.mxu0 %v4789_v61  ;;  %v2959_v54 = vld [vmem:[%s5863_s3 + $0x228] sm:$0xff] }
 0x184   : > { %3949 = vmatprep.subr.mxu1 %v2962_v28 }
 0x185   : > { %3950 = vmatpush3.msra.mxu1 %v2962_v28 }
 0x186   : > { %3951 = vmatprep.subr.mxu1 %v2961_v29  ;;  %4021 = vmatmul.mubr.f32.gmra.mxu0 %v4870_v25  ;;  %v2956_v25 = vld [vmem:[%s5863_s3 + $0x210] sm:$0xff] }
 0x187   : > { %3952 = vmatpush3.msra.mxu1 %v2961_v29  ;;  %4090 = vmatprep.mubr.msk.f32.mxu0 %vm4368_vm2, %v5868_v36 }
 0x188   : > { %3953 = vmatprep.subr.mxu1 %v2960_v30 }
 0x189   : > { %3954 = vmatpush3.msra.mxu1 %v2960_v30 }
 0x18a   : > { %3955 = vmatprep.subr.mxu1 %v2959_v54 }
 0x18b   : > { %3956 = vmatpush3.msra.mxu1 %v2959_v54 }
 0x18c   : > { %3957 = vmatprep.subr.mxu1 %v2958_v32 }
 0x18d   : > { %3958 = vmatpush3.msra.mxu1 %v2958_v32 }
 0x18e   : > { %3959 = vmatprep.subr.mxu1 %v2957_v33 }
 0x18f   : > { %3960 = vmatpush3.msra.mxu1 %v2957_v33 }
 0x190   : > { %3961 = vmatprep.subr.mxu1 %v2956_v25 }
 0x191   : > { %3962 = vmatpush3.msra.mxu1 %v2956_v25 }
 0x192   : > { %3963 = vmatprep.subr.mxu1 %v2955_v34 }
 0x193   : > { %3964 = vmatpush3.msra.mxu1 %v2955_v34 }
 0x194   : > { %3965 = vmatprep.subr.mxu1 %v2954_v35 }
 0x195   : > { %3966 = vmatpush3.msra.mxu1 %v2954_v35 }
 0x196   : > { %3968 = vmatmul.mubr.f32.vlgmr.msra.gmra.mxu1 %v4693_v0  ;;  %4023 = vmatprep.subr.mxu1 %v5868_v36  ;;  %v3049_v0 = vld [vmem:[%s5864_s4 + $0xf0] sm:$0xff] }
 0x197   : > { %3970 = vmatprep.mubr.f32.mxu1 %v4705_v9  ;;  %4024 = vmatpush3.msra.mxu1 %v3050_v38  ;;  %v3048_v9 = vld [vmem:[%s5864_s4 + $0xe8] sm:$0xff] }
 0x198   : > { %4025 = vmatprep.subr.mxu1 %v5868_v36 }
 0x199   : > { %4026 = vmatpush3.msra.mxu1 %v3049_v0 }
 0x19a   : > { %3971 = vmatmul.mubr.f32.gmra.mxu1 %v4723_v21  ;;  %4027 = vmatprep.subr.mxu1 %v5868_v36  ;;  %v3082_v21 = vld [vmem:[%s5864_s4 + $0x1f8] sm:$0xff] }
 0x19b   : > { %3973 = vmatprep.mubr.f32.mxu1 %v4736_v31  ;;  %4028 = vmatpush3.msra.mxu1 %v3048_v9  ;;  %v3047_v31 = vld [vmem:[%s5864_s4 + $0xe0] sm:$0xff] }
 0x19c   : > { %4059 = vmatpush3.msra.mxu0 %v3082_v21  ;;  %4029 = vmatprep.subr.mxu1 %v5868_v36 }
 0x19d   : > { %4060 = vmatprep.subr.mxu0 %v5868_v36  ;;  %4030 = vmatpush3.msra.mxu1 %v3047_v31 }
 0x19e   : > { %3974 = vmatmul.mubr.f32.gmra.mxu1 %v4759_v47  ;;  %v3081_v47 = vld [vmem:[%s5864_s4 + $0x1f0] sm:$0xff]  ;;  %4031 = vmatprep.subr.mxu1 %v5868_v36 }
 0x19f   : > { %3976 = vmatprep.mubr.f32.mxu1 %v4772_v55  ;;  %4061 = vmatpush3.msra.mxu0 %v3081_v47  ;;  %v3046_v55 = vld [vmem:[%s5864_s4 + $0xd8] sm:$0xff] }
 0x1a0   : > { %4062 = vmatprep.subr.mxu0 %v5868_v36  ;;  %4032 = vmatpush3.msra.mxu1 %v3046_v55 }
 0x1a1   : > { %4033 = vmatprep.subr.mxu1 %v5868_v36 }
 0x1a2   : > { %3977 = vmatmul.mubr.f32.gmra.mxu1 %v4789_v61  ;;  %v3080_v61 = vld [vmem:[%s5864_s4 + $0x1e8] sm:$0xff] }
 0x1a3   : > { %4063 = vmatpush3.msra.mxu0 %v3080_v61  ;;  %4034 = vmatpush3.msra.mxu1 %v3045_v39 }
 0x1a4   : > { %4064 = vmatprep.subr.mxu0 %v5868_v36  ;;  %4035 = vmatprep.subr.mxu1 %v5868_v36 }
 0x1a5   : > { %4065 = vmatpush3.msra.mxu0 %v3079_v40  ;;  %4036 = vmatpush3.msra.mxu1 %v3044_v41 }
 0x1a6   : > { %4066 = vmatprep.subr.mxu0 %v5868_v36  ;;  %4037 = vmatprep.subr.mxu1 %v5868_v36 }
 0x1a7   : > { %4067 = vmatpush3.msra.mxu0 %v3078_v42  ;;  %4038 = vmatpush3.msra.mxu1 %v3043_v43 }
 0x1a8   : > { %4068 = vmatprep.subr.mxu0 %v5868_v36  ;;  %4039 = vmatprep.subr.mxu1 %v5868_v36 }
 0x1a9   : > { %4069 = vmatpush3.msra.mxu0 %v3077_v44  ;;  %4040 = vmatpush3.msra.mxu1 %v3042_v45 }
 0x1aa   : > { %4070 = vmatprep.subr.mxu0 %v5868_v36  ;;  %4041 = vmatprep.subr.mxu1 %v5868_v36 }
 0x1ab   : > { %4071 = vmatpush3.msra.mxu0 %v3076_v46  ;;  %4042 = vmatpush3.msra.mxu1 %v3041_v49 }
 0x1ac   : > { %4072 = vmatprep.subr.mxu0 %v5868_v36  ;;  %4043 = vmatprep.subr.mxu1 %v5868_v36 }
 0x1ad   : > { %4073 = vmatpush3.msra.mxu0 %v3075_v50  ;;  %4044 = vmatpush3.msra.mxu1 %v3040_v51 }
 0x1ae   : > { %4074 = vmatprep.subr.mxu0 %v5868_v36  ;;  %4045 = vmatprep.subr.mxu1 %v5868_v36 }
 0x1af   : > { %4075 = vmatpush3.msra.mxu0 %v3074_v52  ;;  %4046 = vmatpush3.msra.mxu1 %v3039_v53 }
 0x1b0   : > { %4076 = vmatprep.subr.mxu0 %v5868_v36  ;;  %4047 = vmatprep.subr.mxu1 %v5868_v36 }
 0x1b1   : > { %4077 = vmatpush3.msra.mxu0 %v3073_v56  ;;  %4048 = vmatpush3.msra.mxu1 %v3038_v58 }
 0x1b2   : > { %4078 = vmatprep.subr.mxu0 %v5868_v36  ;;  %4049 = vmatprep.subr.mxu1 %v5868_v36 }
 0x1b3   : > { %4079 = vmatpush3.msra.mxu0 %v3072_v59  ;;  %4050 = vmatpush3.msra.mxu1 %v3037_v60 }
 0x1b4   : > { %4080 = vmatprep.subr.mxu0 %v5868_v36  ;;  %4051 = vmatprep.subr.mxu1 %v5868_v36 }
 0x1b5   : > { %4081 = vmatpush3.msra.mxu0 %v3071_v62  ;;  %4052 = vmatpush3.msra.mxu1 %v3036_v1 }
 0x1b6   : > { %4082 = vmatprep.subr.mxu0 %v5868_v36  ;;  %4053 = vmatprep.subr.mxu1 %v5868_v36 }
 0x1b7   : > { %4083 = vmatpush3.msra.mxu0 %v3070_v2  ;;  %4054 = vmatpush3.msra.mxu1 %v3035_v4 }
 0x1b8   : > { %4084 = vmatprep.subr.mxu0 %v5868_v36  ;;  %4055 = vmatprep.mubr.msk.f32.mxu1 %vm4368_vm2, %v5868_v36 }
 0x1b9   : > { %4085 = vmatpush3.msra.mxu0 %v3069_v5  ;;  %4093 = vmatprep.subr.mxu1 %v5868_v36 }
 0x1ba   : > { %4086 = vmatprep.subr.mxu0 %v5868_v36 }
 0x1bb   : > { %v5227_v3 = vpop.f32.mrf.mxu1  ;;  %4087 = vmatpush3.msra.mxu0 %v3068_v6 }
 0x1bc   : > { %4088 = vmatprep.subr.mxu0 %v5868_v36 }
 0x1bd   : > { %v744_v7 = vpop.f32.mrf.mxu1  ;;  %4089 = vmatpush3.msra.mxu0 %v3067_v10 }
 0x1be   : > { %4128 = vmatprep.subr.mxu0 %v5868_v36 }
 0x1bf   : > { %v5199_v57 = vpop.f32.mrf.mxu0 }
 0x1c1   : > { %v5217_v63 = vpop.f32.mrf.mxu0 }
 0x1c4   : > { %v5254_v11 = vpop.f32.mrf.mxu1 }
 0x1c6   : > { %v754_v13 = vpop.f32.mrf.mxu1 }
 0x1ca   : > { %v5229_v48 = vpop.f32.mrf.mxu0 }
 0x1cc   : > { %v5245_v8 = vpop.f32.mrf.mxu0 }
 0x1ce   : > { %v5261_v15 = vpop.f32.mrf.mxu1 }
 0x1d0   : > { %v764_v17 = vpop.f32.mrf.mxu1 }
 0x1d4   : > { %v5256_v12 = vpop.f32.mrf.mxu0 }
 0x1d6   : > { %v5259_v14 = vpop.f32.mrf.mxu0 }
 0x1d8   : > { %v5267_v19 = vpop.f32.mrf.mxu1 }
 0x1da   : > { %v774_v20 = vpop.f32.mrf.mxu1 }
 0x1de   : > { %v5263_v16 = vpop.f32.mrf.mxu0 }
 0x1e0   : > { %v5265_v18 = vpop.f32.mrf.mxu0 }
 0x1e2   : > { %v3705_v22 = vpop.f32.mrf.mxu1 }
 0x1e4   : > { %v883_v24 = vpop.f32.mrf.mxu1 }
 0x1e7   : > { %v5275_v27 = vpop.f32.mrf.mxu1 }
 0x1e8   : > { %v5269_v37 = vpop.f32.mrf.mxu0 }
 0x1e9   : > { %v893_v29 = vpop.f32.mrf.mxu1 }
 0x1ea   : > { %v5271_v23 = vpop.f32.mrf.mxu0 }
 0x1ed   : > { %v5281_v54 = vpop.f32.mrf.mxu1 }
 0x1ee   : > { %v5273_v26 = vpop.f32.mrf.mxu0 }
 0x1ef   : > { %v903_v25 = vpop.f32.mrf.mxu1 }
 0x1f0   : > { %v5277_v28 = vpop.f32.mrf.mxu0 }
 0x1f3   : > { %v5287_v34 = vpop.f32.mrf.mxu1 }
 0x1f4   : > { %v5279_v30 = vpop.f32.mrf.mxu0 }
 0x1f5   : > { %v913_v0 = vpop.f32.mrf.mxu1 }
 0x1f6   : > { %v5283_v32 = vpop.f32.mrf.mxu0 }
 0x1f9   : > { %v5285_v33 = vpop.f32.mrf.mxu0 }
 0x1fb   : > { %v5289_v35 = vpop.f32.mrf.mxu0 }
 0x20a   : > { %v3793_v31 = vpop.f32.mrf.mxu1 }
 0x20c   : > { %v1161_v55 = vpop.f32.mrf.mxu1 }
 0x20f   : > { %v3796_v40 = vpop.f32.mrf.mxu1 }
 0x210   : > { %v3925_v38 = vpop.f32.mrf.mxu0 }
 0x211   : > { %v1171_v44 = vpop.f32.mrf.mxu1 }
 0x212   : > { %v1493_v9 = vpop.f32.mrf.mxu0 }
 0x213   : > { %v1494_v21 = vadd.f32 %v1493_v9, %v883_v24 }
 0x215   : > { %v5295_v49 = vpop.f32.mrf.mxu1 }
 0x216   : > { %v3928_v47 = vpop.f32.mrf.mxu0 }
 0x217   : > { %v1181_v51 = vpop.f32.mrf.mxu1 }
 0x218   : > { %v1503_v61 = vpop.f32.mrf.mxu0 }
 0x219   : > { %v1504_v39 = vadd.f32 %v1503_v61, %v893_v29 }
 0x21b   : > { %v5297_v52 = vpop.f32.mrf.mxu1 }
 0x21c   : > { %v5291_v41 = vpop.f32.mrf.mxu0 }
 0x21d   : > { %v5299_v53 = vpop.f32.mrf.mxu1 }
 0x21e   : > { %v1513_v42 = vpop.f32.mrf.mxu0 }
 0x21f   : > { %v1514_v43 = vadd.f32 %v1513_v42, %v903_v25 }
 0x221   : > { %v5293_v45 = vpop.f32.mrf.mxu0 }
 0x223   : > { %v1523_v46 = vpop.f32.mrf.mxu0 }
 0x224   : > { %v1524_v50 = vadd.f32 %v1523_v46, %v913_v0 }
 0x232   : > { %v3881_v56 = vpop.f32.mrf.mxu1 }
 0x234   : > { %v1388_v58 = vpop.f32.mrf.mxu1 }
 0x235   : > { %v1389_v59 = vadd.f32 %v1388_v58, %v744_v7 }
 0x237   : > { %v1742_v60 = vadd.f32 %v1494_v21, %v1389_v59  ;;  %v3884_v62 = vpop.f32.mrf.mxu1 }
 0x238   : > { %v4013_v1 = vpop.f32.mrf.mxu0 }
 0x239   : > { %v1398_v2 = vpop.f32.mrf.mxu1 }
 0x23a   : > { %v1399_v4 = vadd.f32 %v1398_v2, %v754_v13  ;;  %v1703_v5 = vpop.f32.mrf.mxu0  ;;  %v1394_v13 = vadd.f32 %v3881_v56, %v5227_v3  ;;  %v1709_v2 = vadd.f32 %v4013_v1, %v3793_v31 }
 0x23b   : > { %v1704_v6 = vadd.f32 %v1703_v5, %v1161_v55 }
 0x23c   : > { %v1744_v10 = vadd.f32 %v1504_v39, %v1399_v4  ;;  %v5301_v24 = vpop.f32.mrf.mxu1  ;;  %v1499_v39 = vadd.f32 %v3925_v38, %v3705_v22 }
 0x23d   : > { %v4016_v29 = vpop.f32.mrf.mxu0 }
 0x23e   : > { %v1408_v25 = vpop.f32.mrf.mxu1  ;;  %v1743_v5 = vadd.f32 %v1499_v39, %v1394_v13 }
 0x23f   : > { %v1409_v0 = vadd.f32 %v1408_v25, %v764_v17  ;;  %v1713_v9 = vpop.f32.mrf.mxu0  ;;  %v1404_v17 = vadd.f32 %v3884_v62, %v5254_v11 }
 0x240   : > { %v1714_v22 = vadd.f32 %v1713_v9, %v1171_v44 }
 0x241   : > { %v1746_v61 = vadd.f32 %v1514_v43, %v1409_v0  ;;  %v5303_v42 = vpop.f32.mrf.mxu1 }
 0x242   : > { %v5305_v46 = vpop.f32.mrf.mxu0 }
 0x243   : > { %v1418_v7 = vpop.f32.mrf.mxu1 }
 0x244   : > { %v1419_v21 = vadd.f32 %v1418_v7, %v774_v20  ;;  %v1723_v58 = vpop.f32.mrf.mxu0  ;;  %v1509_v20 = vadd.f32 %v3928_v47, %v5275_v27 }
 0x245   : > { %v1724_v59 = vadd.f32 %v1723_v58, %v1181_v51  ;;  %v1719_v51 = vadd.f32 %v4016_v29, %v3796_v40 }
 0x246   : > { %v5307_v36 = vadd.f32 %v1524_v50, %v1419_v21  ;;  %v1745_v56 = vadd.f32 %v1509_v20, %v1404_v17  ;;  %v5322_v47 = vpop.f32.mrf.mxu0 }
 0x256   : > { %v3969_v55 = vpop.f32.mrf.mxu1 }
 0x257   : > { %v1604_v4 = vadd.f32 %v3969_v55, %v5199_v57  ;;  %v5318_v57 = vld [vmem:[%s5866_s6 + $0x1] ss:$0 sm:$0xff] }
 0x258   : > { %v1598_v43 = vpop.f32.mrf.mxu1 }
 0x259   : > { %v1751_v25 = vadd.f32 %v1709_v2, %v1604_v4  ;;  %v1599_v0 = vadd.f32 %v1598_v43, %v5217_v63 }
 0x25a   : > { %v3972_v7 = vpop.f32.mrf.mxu1 }
 0x25b   : > { %v1759_v50 = vadd.f32 %v1751_v25, %v1743_v5  ;;  %v1750_v21 = vadd.f32 %v1704_v6, %v1599_v0  ;;  %v1614_v3 = vadd.f32 %v3972_v7, %v5229_v48  ;;  %v3144_v7 = vld [vmem:[%s5864_s4 + $0x3e8] sm:$0xff] }
 0x25c   : > { %v1608_v11 = vpop.f32.mrf.mxu1 }
 0x25d   : > { %v1767_v38 = vadd.f32 %v5269_v37, %v1759_v50  ;;  %v1758_v31 = vadd.f32 %v1750_v21, %v1742_v60  ;;  %v1753_v63 = vadd.f32 %v1719_v51, %v1614_v3  ;;  %v1609_v27 = vadd.f32 %v1608_v11, %v5245_v8  ;;  %v3114_v8 = vld [vmem:[%s5864_s4 + $0x2f8] sm:$0xff]  ;;  %v1733_v60 = vpop.f32.mrf.mxu0  ;;  %v3143_v21 = vld [vmem:[%s5864_s4 + $0x3e0] sm:$0xff] }
 0x25e   : > { %v3975_v40 = vpop.f32.mrf.mxu1  ;;  %v1734_v4 = vadd.f32 %v1733_v60, %v5299_v53  ;;  %v1729_v11 = vadd.f32 %v5305_v46, %v5295_v49  ;;  %v3106_v49 = vld [vmem:[%s5864_s4 + $0x2b8] sm:$0xff]  ;;  %v3140_v46 = vld [vmem:[%s5864_s4 + $0x3c8] sm:$0xff] }
 0x25f   : > { %v1779_v62 = vadd.f32 %v5318_v57, %v1767_v38  ;;  %v1766_v48 = vadd.f32 %v1758_v31, %v5271_v23  ;;  %v1761_v44 = vadd.f32 %v1753_v63, %v1745_v56  ;;  %v1752_v1 = vadd.f32 %v1714_v22, %v1609_v27  ;;  %v3142_v56 = vld [vmem:[%s5864_s4 + $0x3d8] sm:$0xff]  ;;  %v3107_v38 = vld [vmem:[%s5864_s4 + $0x2c0] sm:$0xff]  ;;  %v3141_v31 = vld [vmem:[%s5864_s4 + $0x3d0] sm:$0xff] }
 0x260   : > { %v1618_v6 = vpop.f32.mrf.mxu1  ;;  %v1624_v3 = vadd.f32 %v3975_v40, %v5256_v12  ;;  %v1414_v12 = vadd.f32 %v5301_v24, %v5261_v15  ;;  %v1519_v15 = vadd.f32 %v5291_v41, %v5281_v54  ;;  %v3105_v54 = vld [vmem:[%s5864_s4 + $0x2b0] sm:$0xff]  ;;  %v3139_v41 = vld [vmem:[%s5864_s4 + $0x3c0] sm:$0xff]  ;;  %v1424_v40 = vadd.f32 %v5303_v42, %v5267_v19 }
 0x261   : > { %v1787_v29 = vmax.f32 %v1779_v62, 0.0  ;;  %v1769_v9 = vadd.f32 %v5273_v26, %v1761_v44  ;;  %v1760_v58 = vadd.f32 %v1752_v1, %v1744_v10  ;;  %v1619_v37 = vadd.f32 %v1618_v6, %v5259_v14  ;;  %v3113_v14 = vld [vmem:[%s5864_s4 + $0x2f0] sm:$0xff]  ;;  %v3138_v44 = vld [vmem:[%s5864_s4 + $0x3b8] sm:$0xff]  ;;  %v3136_v6 = vld [vmem:[%s5864_s4 + $0x3a8] sm:$0xff] }
 0x262   : > { %v5331_v13 = vpop.f32.mrf.mxu1  ;;  %v5334_v55 = vadd.f32 %v5318_v57, %v1766_v48  ;;  %v5870_v10 = vmov 0.0   ;;  %v1755_v24 = vadd.f32 %v1729_v11, %v1624_v3  ;;  %v1747_v27 = vadd.f32 %v1519_v15, %v1414_v12  ;;  %v3104_v48 = vld [vmem:[%s5864_s4 + $0x2a8] sm:$0xff]  ;;  %v3059_v3 = vld [vmem:[%s5864_s4 + $0x140] sm:$0xff]  ;;  %v3057_v11 = vld [vmem:[%s5864_s4 + $0x130] sm:$0xff] }
 0x263   : > { %v1781_v23 = vadd.f32 %v5318_v57, %v1769_v9  ;;  %v1768_v39 = vadd.f32 %v1760_v58, %v5277_v28  ;;  %v1754_v2 = vadd.f32 %v1724_v59, %v1619_v37  ;;  %4056 = vmatmul.mubr.f32.vlgmr.msra.gmra.mxu1 %v1787_v29  ;;  %v3112_v28 = vld [vmem:[%s5864_s4 + $0x2e8] sm:$0xff]  ;;  %v3146_v59 = vld [vmem:[%s5864_s4 + $0x3f8] sm:$0xff]  ;;  %v1634_v63 = vadd.f32 %v5331_v13, %v5263_v16  ;;  %v3135_v9 = vld [vmem:[%s5864_s4 + $0x3a0] sm:$0xff] }
 0x264   : > { %4094 = vmatpush3.msra.mxu1 %v3114_v8  ;;  %v1628_v26 = vpop.f32.mrf.mxu1  ;;  %4125 = vmatprep.mubr.msk.f32.mxu1 %vm4368_vm2, %v5870_v10  ;;  %v1739_v16 = vadd.f32 %v5322_v47, %v5297_v52  ;;  %v1763_v62 = vadd.f32 %v1755_v24, %v1747_v27  ;;  %v1529_v19 = vadd.f32 %v5293_v45, %v5287_v34  ;;  %v3103_v52 = vld [vmem:[%s5864_s4 + $0x2a0] sm:$0xff]  ;;  %v3137_v47 = vld [vmem:[%s5864_s4 + $0x3b0] sm:$0xff]  ;;  %v3102_v45 = vld [vmem:[%s5864_s4 + $0x298] sm:$0xff] }
 0x265   : > { %v1789_v17 = vmax.f32 %v1781_v23, 0.0  ;;  %v1762_v43 = vadd.f32 %v1754_v2, %v1746_v61  ;;  %v1629_v5 = vadd.f32 %v1628_v26, %v5265_v18  ;;  %4095 = vmatprep.subr.mxu1 %v5870_v10  ;;  %v5353_v25 = vadd.f32 %v5318_v57, %v1768_v39  ;;  %v3111_v18 = vld [vmem:[%s5864_s4 + $0x2e0] sm:$0xff]  ;;  %v3145_v61 = vld [vmem:[%s5864_s4 + $0x3f0] sm:$0xff]  ;;  %v3100_v58 = vld [vmem:[%s5864_s4 + $0x288] sm:$0xff] }
 0x266   : > { %4096 = vmatpush3.msra.mxu1 %v3113_v14  ;;  %v1757_v42 = vadd.f32 %v1739_v16, %v1634_v63  ;;  %v1749_v1 = vadd.f32 %v1529_v19, %v1424_v40  ;;  %v1771_v34 = vadd.f32 %v5279_v30, %v1763_v62  ;;  %v3101_v30 = vld [vmem:[%s5864_s4 + $0x290] sm:$0xff]  ;;  %v3134_v37 = vld [vmem:[%s5864_s4 + $0x398] sm:$0xff]  ;;  %v3099_v13 = vld [vmem:[%s5864_s4 + $0x280] sm:$0xff] }
 0x267   : > { %v1770_v53 = vadd.f32 %v1762_v43, %v5283_v32  ;;  %v1756_v0 = vadd.f32 %v1734_v4, %v1629_v5  ;;  %4097 = vmatprep.subr.mxu1 %v5870_v10  ;;  %4091 = vmatmul.mubr.f32.vlgmr.msra.gmra.mxu0 %v1789_v17  ;;  %v3110_v32 = vld [vmem:[%s5864_s4 + $0x2d8] sm:$0xff]  ;;  %v3133_v23 = vld [vmem:[%s5864_s4 + $0x390] sm:$0xff]  ;;  %v3132_v39 = vld [vmem:[%s5864_s4 + $0x388] sm:$0xff]  ;;  %v1788_v62 = vmax.f32 %v5353_v25, 0.0 }
 0x268   : > { %4098 = vmatpush3.msra.mxu1 %v3112_v28  ;;  %4129 = vmatpush3.msra.mxu0 %v3146_v59  ;;  %v1765_v29 = vadd.f32 %v1757_v42, %v1749_v1  ;;  %v1783_v8 = vadd.f32 %v5318_v57, %v1771_v34  ;;  %v1809_v2 = vld [vmem:[%s5864_s4 + $0x78] sm:$0xff]  ;;  %v3131_v26 = vld [vmem:[%s5864_s4 + $0x380] sm:$0xff]  ;;  %v1808_v4 = vld [vmem:[%s5864_s4 + $0x70] sm:$0xff] }
 0x269   : > { %v1764_v20 = vadd.f32 %v1756_v0, %v5307_v36  ;;  %4099 = vmatprep.subr.mxu1 %v5870_v10  ;;  %4130 = vmatprep.subr.mxu0 %v5870_v10  ;;  %v5373_v51 = vadd.f32 %v5318_v57, %v1770_v53  ;;  %v3109_v36 = vld [vmem:[%s5864_s4 + $0x2d0] sm:$0xff]  ;;  %v1807_v17 = vld [vmem:[%s5864_s4 + $0x68] sm:$0xff]  ;;  %v3066_v43 = vld [vmem:[%s5864_s4 + $0x178] sm:$0xff] }
 0x26a   : > { %4100 = vmatpush3.msra.mxu1 %v3111_v18  ;;  %4131 = vmatpush3.msra.mxu0 %v3145_v61  ;;  %v1773_v60 = vadd.f32 %v5285_v33, %v1765_v29  ;;  %v1791_v33 = vmax.f32 %v1783_v8, 0.0  ;;  %v1806_v5 = vld [vmem:[%s5864_s4 + $0x60] sm:$0xff]  ;;  %v3065_v28 = vld [vmem:[%s5864_s4 + $0x170] sm:$0xff]  ;;  %v1805_v59 = vld [vmem:[%s5864_s4 + $0x58] sm:$0xff] }
 0x26b   : > { %v1772_v50 = vadd.f32 %v1764_v20, %v5289_v35  ;;  %4101 = vmatprep.subr.mxu1 %v5870_v10  ;;  %4132 = vmatprep.subr.mxu0 %v5870_v10  ;;  %v3108_v35 = vld [vmem:[%s5864_s4 + $0x2c8] sm:$0xff]  ;;  %v1804_v0 = vld [vmem:[%s5864_s4 + $0x50] sm:$0xff]  ;;  %v3063_v18 = vld [vmem:[%s5864_s4 + $0x160] sm:$0xff] }
 0x26c   : > { %4102 = vmatpush3.msra.mxu1 %v3110_v32  ;;  %4133 = vmatpush3.msra.mxu0 %v3144_v7  ;;  %v1785_v14 = vadd.f32 %v5318_v57, %v1773_v60  ;;  %v3064_v53 = vld [vmem:[%s5864_s4 + $0x168] sm:$0xff]  ;;  %v3062_v20 = vld [vmem:[%s5864_s4 + $0x158] sm:$0xff]  ;;  %v1802_v32 = vld [vmem:[%s5864_s4 + $0x40] sm:$0xff] }
 0x26d   : > { %4103 = vmatprep.subr.mxu1 %v5870_v10  ;;  %4134 = vmatprep.subr.mxu0 %v5870_v10  ;;  %v5394_v22 = vadd.f32 %v5318_v57, %v1772_v50  ;;  %v1803_v61 = vld [vmem:[%s5864_s4 + $0x48] sm:$0xff]  ;;  %v3061_v7 = vld [vmem:[%s5864_s4 + $0x150] sm:$0xff]  ;;  %v1801_v50 = vld [vmem:[%s5864_s4 + $0x38] sm:$0xff] }
 0x26e   : > { %4104 = vmatpush3.msra.mxu1 %v3109_v36  ;;  %4135 = vmatpush3.msra.mxu0 %v3143_v21  ;;  %v1793_v57 = vmax.f32 %v1785_v14, 0.0  ;;  %v3060_v36 = vld [vmem:[%s5864_s4 + $0x148] sm:$0xff]  ;;  %v1800_v21 = vld [vmem:[%s5864_s4 + $0x30] sm:$0xff]  ;;  %v1798_v12 = vld [vmem:[%s5864_s4 + $0x20] sm:$0xff] }
 0x26f   : > { %4105 = vmatprep.subr.mxu1 %v5870_v10  ;;  %4136 = vmatprep.subr.mxu0 %v5870_v10  ;;  %v1796_v15 = vld [vmem:[%s5864_s4 + $0x10] sm:$0xff]  ;;  %v3055_v24 = vld [vmem:[%s5864_s4 + $0x120] sm:$0xff]  ;;  %v3098_v40 = vld [vmem:[%s5864_s4 + $0x278] sm:$0xff] }
 0x270   : > { %4106 = vmatpush3.msra.mxu1 %v3108_v35  ;;  %4137 = vmatpush3.msra.mxu0 %v3142_v56  ;;  %v1799_v35 = vld [vmem:[%s5864_s4 + $0x28] sm:$0xff]  ;;  %v3058_v56 = vld [vmem:[%s5864_s4 + $0x138] sm:$0xff]  ;;  %v1794_v63 = vld [vmem:[%s5864_s4] sm:$0xff] }
 0x271   : > { %4107 = vmatprep.subr.mxu1 %v5870_v10  ;;  %4138 = vmatprep.subr.mxu0 %v5870_v10  ;;  %v3053_v27 = vld [vmem:[%s5864_s4 + $0x110] sm:$0xff]  ;;  %v3051_v16 = vld [vmem:[%s5864_s4 + $0x100] sm:$0xff]  ;;  %v3094_v42 = vld [vmem:[%s5864_s4 + $0x258] sm:$0xff] }
 0x272   : > { %4108 = vmatpush3.msra.mxu1 %v3107_v38  ;;  %4139 = vmatpush3.msra.mxu0 %v3141_v31  ;;  %v1797_v38 = vld [vmem:[%s5864_s4 + $0x18] sm:$0xff]  ;;  %v3056_v31 = vld [vmem:[%s5864_s4 + $0x128] sm:$0xff]  ;;  %v3095_v19 = vld [vmem:[%s5864_s4 + $0x260] sm:$0xff] }
 0x273   : > { %4109 = vmatprep.subr.mxu1 %v5870_v10  ;;  %4140 = vmatprep.subr.mxu0 %v5870_v10  ;;  %v3129_v25 = vld [vmem:[%s5864_s4 + $0x370] sm:$0xff]  ;;  %v3127_v1 = vld [vmem:[%s5864_s4 + $0x360] sm:$0xff]  ;;  %v3092_v34 = vld [vmem:[%s5864_s4 + $0x248] sm:$0xff] }
 0x274   : > { %4110 = vmatpush3.msra.mxu1 %v3106_v49  ;;  %4141 = vmatpush3.msra.mxu0 %v3140_v46  ;;  %v1795_v49 = vld [vmem:[%s5864_s4 + $0x8] sm:$0xff]  ;;  %v3054_v46 = vld [vmem:[%s5864_s4 + $0x118] sm:$0xff]  ;;  %v3125_v29 = vld [vmem:[%s5864_s4 + $0x350] sm:$0xff] }
 0x275   : > { %4111 = vmatprep.subr.mxu1 %v5870_v10  ;;  %4142 = vmatprep.subr.mxu0 %v5870_v10  ;;  %v3088_v8 = vld [vmem:[%s5864_s4 + $0x228] sm:$0xff]  ;;  %v3122_v60 = vld [vmem:[%s5864_s4 + $0x338] sm:$0xff]  ;;  %v3119_v14 = vld [vmem:[%s5864_s4 + $0x320] sm:$0xff] }
 0x276   : > { %4112 = vmatpush3.msra.mxu1 %v3105_v54  ;;  %4143 = vmatpush3.msra.mxu0 %v3139_v41  ;;  %v1786_v54 = vmax.f32 %v5334_v55, 0.0  ;;  %v3052_v41 = vld [vmem:[%s5864_s4 + $0x108] sm:$0xff]  ;;  %v3097_v55 = vld [vmem:[%s5864_s4 + $0x270] sm:$0xff] }
 0x277   : > { %4113 = vmatprep.subr.mxu1 %v5870_v10  ;;  %4144 = vmatprep.subr.mxu0 %v5870_v10 }
 0x278   : > { %4114 = vmatpush3.msra.mxu1 %v3104_v48  ;;  %4145 = vmatpush3.msra.mxu0 %v3138_v44  ;;  %v3096_v48 = vld [vmem:[%s5864_s4 + $0x268] sm:$0xff]  ;;  %v3130_v44 = vld [vmem:[%s5864_s4 + $0x378] sm:$0xff] }
 0x279   : > { %4115 = vmatprep.subr.mxu1 %v5870_v10  ;;  %4146 = vmatprep.subr.mxu0 %v5870_v10 }
 0x27a   : > { %4116 = vmatpush3.msra.mxu1 %v3103_v52  ;;  %4147 = vmatpush3.msra.mxu0 %v3137_v47  ;;  %v3128_v52 = vld [vmem:[%s5864_s4 + $0x368] sm:$0xff]  ;;  %v3093_v47 = vld [vmem:[%s5864_s4 + $0x250] sm:$0xff] }
 0x27b   : > { %4117 = vmatprep.subr.mxu1 %v5870_v10  ;;  %4148 = vmatprep.subr.mxu0 %v5870_v10 }
 0x27c   : > { %4118 = vmatpush3.msra.mxu1 %v3102_v45  ;;  %4149 = vmatpush3.msra.mxu0 %v3136_v6  ;;  %v3126_v45 = vld [vmem:[%s5864_s4 + $0x358] sm:$0xff]  ;;  %v3091_v6 = vld [vmem:[%s5864_s4 + $0x240] sm:$0xff] }
 0x27d   : > { %4119 = vmatprep.subr.mxu1 %v5870_v10  ;;  %4150 = vmatprep.subr.mxu0 %v5870_v10 }
 0x27e   : > { %4120 = vmatpush3.msra.mxu1 %v3101_v30  ;;  %4151 = vmatpush3.msra.mxu0 %v3135_v9  ;;  %v3090_v30 = vld [vmem:[%s5864_s4 + $0x238] sm:$0xff]  ;;  %v3124_v9 = vld [vmem:[%s5864_s4 + $0x348] sm:$0xff] }
 0x27f   : > { %4121 = vmatprep.subr.mxu1 %v5870_v10  ;;  %4152 = vmatprep.subr.mxu0 %v5870_v10 }
 0x280   : > { %4122 = vmatpush3.msra.mxu1 %v3100_v58  ;;  %4153 = vmatpush3.msra.mxu0 %v3134_v37  ;;  %v3089_v58 = vld [vmem:[%s5864_s4 + $0x230] sm:$0xff]  ;;  %v3123_v37 = vld [vmem:[%s5864_s4 + $0x340] sm:$0xff] }
 0x281   : > { %4123 = vmatprep.subr.mxu1 %v5870_v10  ;;  %4154 = vmatprep.subr.mxu0 %v5870_v10 }
 0x282   : > { %4124 = vmatpush3.msra.mxu1 %v3099_v13  ;;  %4155 = vmatpush3.msra.mxu0 %v3133_v23  ;;  %v3087_v13 = vld [vmem:[%s5864_s4 + $0x220] sm:$0xff]  ;;  %v3121_v23 = vld [vmem:[%s5864_s4 + $0x330] sm:$0xff] }
 0x283   : > { %4126 = vmatmul.mubr.f32.vlgmr.msra.gmra.mxu1 %v1791_v33  ;;  %4156 = vmatprep.subr.mxu0 %v5870_v10  ;;  %v3086_v33 = vld [vmem:[%s5864_s4 + $0x218] sm:$0xff] }
 0x284   : > { %4163 = vmatprep.subr.mxu1 %v5870_v10  ;;  %4157 = vmatpush3.msra.mxu0 %v3132_v39  ;;  %v3120_v39 = vld [vmem:[%s5864_s4 + $0x328] sm:$0xff] }
 0x285   : > { %4164 = vmatpush3.msra.mxu1 %v1809_v2  ;;  %4158 = vmatprep.subr.mxu0 %v5870_v10  ;;  %v3085_v2 = vld [vmem:[%s5864_s4 + $0x210] sm:$0xff] }
 0x286   : > { %4165 = vmatprep.subr.mxu1 %v5870_v10  ;;  %4159 = vmatpush3.msra.mxu0 %v3131_v26  ;;  %v3084_v26 = vld [vmem:[%s5864_s4 + $0x208] sm:$0xff] }
 0x287   : > { %4160 = vmatprep.mubr.msk.f32.mxu0 %vm4368_vm2, %v5870_v10  ;;  %4166 = vmatpush3.msra.mxu1 %v1808_v4  ;;  %v3118_v4 = vld [vmem:[%s5864_s4 + $0x318] sm:$0xff] }
 0x288   : > { %4161 = vmatmul.mubr.f32.vlgmr.msra.gmra.mxu0 %v1793_v57  ;;  %4167 = vmatprep.subr.mxu1 %v5870_v10  ;;  %v3083_v57 = vld [vmem:[%s5864_s4 + $0x200] sm:$0xff] }
 0x289   : > { %4198 = vmatprep.subr.mxu0 %v5870_v10  ;;  %4168 = vmatpush3.msra.mxu1 %v1807_v17  ;;  %v3117_v17 = vld [vmem:[%s5864_s4 + $0x310] sm:$0xff] }
 0x28a   : > { %4199 = vmatpush3.msra.mxu0 %v3066_v43  ;;  %4169 = vmatprep.subr.mxu1 %v5870_v10  ;;  %v1790_v43 = vmax.f32 %v5373_v51, 0.0  ;;  %v1792_v51 = vmax.f32 %v5394_v22, 0.0 }
 0x28b   : > { %4200 = vmatprep.subr.mxu0 %v5870_v10  ;;  %4170 = vmatpush3.msra.mxu1 %v1806_v5  ;;  %v3116_v5 = vld [vmem:[%s5864_s4 + $0x308] sm:$0xff] }
 0x28c   : > { %4201 = vmatpush3.msra.mxu0 %v3065_v28  ;;  %4171 = vmatprep.subr.mxu1 %v5870_v10  ;;  %v3115_v28 = vld [vmem:[%s5864_s4 + $0x300] sm:$0xff] }
 0x28d   : > { %4202 = vmatprep.subr.mxu0 %v5870_v10  ;;  %4172 = vmatpush3.msra.mxu1 %v1805_v59 }
 0x28e   : > { %4203 = vmatpush3.msra.mxu0 %v3064_v53  ;;  %4173 = vmatprep.subr.mxu1 %v5870_v10 }
 0x28f   : > { %4204 = vmatprep.subr.mxu0 %v5870_v10  ;;  %4174 = vmatpush3.msra.mxu1 %v1804_v0 }
 0x290   : > { %4205 = vmatpush3.msra.mxu0 %v3063_v18  ;;  %4175 = vmatprep.subr.mxu1 %v5870_v10 }
 0x291   : > { %4206 = vmatprep.subr.mxu0 %v5870_v10  ;;  %4176 = vmatpush3.msra.mxu1 %v1803_v61 }
 0x292   : > { %4207 = vmatpush3.msra.mxu0 %v3062_v20  ;;  %4177 = vmatprep.subr.mxu1 %v5870_v10 }
 0x293   : > { %4208 = vmatprep.subr.mxu0 %v5870_v10  ;;  %4178 = vmatpush3.msra.mxu1 %v1802_v32 }
 0x294   : > { %4209 = vmatpush3.msra.mxu0 %v3061_v7  ;;  %4179 = vmatprep.subr.mxu1 %v5870_v10 }
 0x295   : > { %4210 = vmatprep.subr.mxu0 %v5870_v10  ;;  %4180 = vmatpush3.msra.mxu1 %v1801_v50 }
 0x296   : > { %4211 = vmatpush3.msra.mxu0 %v3060_v36  ;;  %4181 = vmatprep.subr.mxu1 %v5870_v10 }
 0x297   : > { %4212 = vmatprep.subr.mxu0 %v5870_v10  ;;  %4182 = vmatpush3.msra.mxu1 %v1800_v21 }
 0x298   : > { %4213 = vmatpush3.msra.mxu0 %v3059_v3  ;;  %4183 = vmatprep.subr.mxu1 %v5870_v10 }
 0x299   : > { %4214 = vmatprep.subr.mxu0 %v5870_v10  ;;  %4184 = vmatpush3.msra.mxu1 %v1799_v35 }
 0x29a   : > { %4215 = vmatpush3.msra.mxu0 %v3058_v56  ;;  %4185 = vmatprep.subr.mxu1 %v5870_v10 }
 0x29b   : > { %4216 = vmatprep.subr.mxu0 %v5870_v10  ;;  %4186 = vmatpush3.msra.mxu1 %v1798_v12 }
 0x29c   : > { %4217 = vmatpush3.msra.mxu0 %v3057_v11  ;;  %4187 = vmatprep.subr.mxu1 %v5870_v10 }
 0x29d   : > { %4218 = vmatprep.subr.mxu0 %v5870_v10  ;;  %4188 = vmatpush3.msra.mxu1 %v1797_v38 }
 0x29e   : > { %4219 = vmatpush3.msra.mxu0 %v3056_v31  ;;  %4189 = vmatprep.subr.mxu1 %v5870_v10 }
 0x29f   : > { %4220 = vmatprep.subr.mxu0 %v5870_v10  ;;  %4190 = vmatpush3.msra.mxu1 %v1796_v15 }
 0x2a0   : > { %4221 = vmatpush3.msra.mxu0 %v3055_v24  ;;  %4191 = vmatprep.subr.mxu1 %v5870_v10 }
 0x2a1   : > { %4222 = vmatprep.subr.mxu0 %v5870_v10  ;;  %4192 = vmatpush3.msra.mxu1 %v1795_v49 }
 0x2a2   : > { %4223 = vmatpush3.msra.mxu0 %v3054_v46  ;;  %4193 = vmatprep.subr.mxu1 %v5870_v10  ;;  %v3147_v46 = vld [vmem:[%s5866_s6 + $0x2] ss:$0 sm:$0xff] }
 0x2a3   : > { %4224 = vmatprep.subr.mxu0 %v5870_v10  ;;  %4194 = vmatpush3.msra.mxu1 %v1794_v63 }
 0x2a4   : > { %4195 = vmatprep.mubr.msk.f32.mxu1 %vm4368_vm2, %v5870_v10  ;;  %4225 = vmatpush3.msra.mxu0 %v3053_v27 }
 0x2a5   : > { %4196 = vmatmul.mubr.f32.vlgmr.msra.gmra.mxu1 %v1786_v54  ;;  %4226 = vmatprep.subr.mxu0 %v5870_v10 }
 0x2a6   : > { %4233 = vmatprep.subr.mxu1 %v5870_v10  ;;  %4227 = vmatpush3.msra.mxu0 %v3052_v41 }
 0x2a7   : > { %4234 = vmatpush3.msra.mxu1 %v3098_v40  ;;  %4228 = vmatprep.subr.mxu0 %v5870_v10 }
 0x2a8   : > { %4235 = vmatprep.subr.mxu1 %v5870_v10  ;;  %4229 = vmatpush3.msra.mxu0 %v3051_v16 }
 0x2a9   : > { %4230 = vmatprep.mubr.msk.f32.mxu0 %vm4368_vm2, %v5870_v10  ;;  %4236 = vmatpush3.msra.mxu1 %v3097_v55 }
 0x2aa   : > { %4231 = vmatmul.mubr.f32.vlgmr.msra.gmra.mxu0 %v1788_v62  ;;  %4237 = vmatprep.subr.mxu1 %v5870_v10 }
 0x2ab   : > { %4268 = vmatprep.subr.mxu0 %v5870_v10  ;;  %4238 = vmatpush3.msra.mxu1 %v3096_v48  ;;  %v2525_v48 = vld [vmem:[%s5865_s5 + $0x18] sm:$0xff] }
 0x2ac   : > { %4269 = vmatpush3.msra.mxu0 %v3130_v44  ;;  %4239 = vmatprep.subr.mxu1 %v5870_v10  ;;  %v2524_v44 = vld [vmem:[%s5865_s5 + $0x10] sm:$0xff] }
 0x2ad   : > { %4270 = vmatprep.subr.mxu0 %v5870_v10  ;;  %4240 = vmatpush3.msra.mxu1 %v3095_v19  ;;  %v2523_v19 = vld [vmem:[%s5865_s5 + $0x8] sm:$0xff] }
 0x2ae   : > { %4271 = vmatpush3.msra.mxu0 %v3129_v25  ;;  %4241 = vmatprep.subr.mxu1 %v5870_v10  ;;  %v2522_v25 = vld [vmem:[%s5865_s5] sm:$0xff] }
 0x2af   : > { %4272 = vmatprep.subr.mxu0 %v5870_v10  ;;  %4242 = vmatpush3.msra.mxu1 %v3094_v42  ;;  %v3155_v42 = vld [vmem:[%s5865_s5 + $0x38] sm:$0xff] }
 0x2b0   : > { %4273 = vmatpush3.msra.mxu0 %v3128_v52  ;;  %4243 = vmatprep.subr.mxu1 %v5870_v10 }
 0x2b1   : > { %4274 = vmatprep.subr.mxu0 %v5870_v10  ;;  %4244 = vmatpush3.msra.mxu1 %v3093_v47 }
 0x2b2   : > { %4275 = vmatpush3.msra.mxu0 %v3127_v1  ;;  %4245 = vmatprep.subr.mxu1 %v5870_v10 }
 0x2b3   : > { %4276 = vmatprep.subr.mxu0 %v5870_v10  ;;  %4246 = vmatpush3.msra.mxu1 %v3092_v34 }
 0x2b4   : > { %4277 = vmatpush3.msra.mxu0 %v3126_v45  ;;  %4247 = vmatprep.subr.mxu1 %v5870_v10  ;;  %v3148_v45 = vld [vmem:[%s5866_s6 + $0x3] ss:$0 sm:$0xff] }
 0x2b5   : > { %4278 = vmatprep.subr.mxu0 %v5870_v10  ;;  %4248 = vmatpush3.msra.mxu1 %v3091_v6 }
 0x2b6   : > { %4279 = vmatpush3.msra.mxu0 %v3125_v29  ;;  %4249 = vmatprep.subr.mxu1 %v5870_v10  ;;  %v3149_v29 = vld [vmem:[%s5866_s6 + $0x4] ss:$0 sm:$0xff] }
 0x2b7   : > { %4280 = vmatprep.subr.mxu0 %v5870_v10  ;;  %4250 = vmatpush3.msra.mxu1 %v3090_v30 }
 0x2b8   : > { %4281 = vmatpush3.msra.mxu0 %v3124_v9  ;;  %4251 = vmatprep.subr.mxu1 %v5870_v10 }
 0x2b9   : > { %4282 = vmatprep.subr.mxu0 %v5870_v10  ;;  %4252 = vmatpush3.msra.mxu1 %v3089_v58  ;;  %v3154_v58 = vld [vmem:[%s5865_s5 + $0x30] sm:$0xff] }
 0x2ba   : > { %4283 = vmatpush3.msra.mxu0 %v3123_v37  ;;  %4253 = vmatprep.subr.mxu1 %v5870_v10  ;;  %v3153_v37 = vld [vmem:[%s5865_s5 + $0x28] sm:$0xff] }
 0x2bb   : > { %4284 = vmatprep.subr.mxu0 %v5870_v10  ;;  %4254 = vmatpush3.msra.mxu1 %v3088_v8  ;;  %v3152_v8 = vld [vmem:[%s5865_s5 + $0x20] sm:$0xff] }
 0x2bc   : > { %4285 = vmatpush3.msra.mxu0 %v3122_v60  ;;  %4255 = vmatprep.subr.mxu1 %v5870_v10  ;;  %v3161_v60 = vld [vmem:[%s5865_s5 + $0x58] sm:$0xff] }
 0x2bd   : > { %4286 = vmatprep.subr.mxu0 %v5870_v10  ;;  %4256 = vmatpush3.msra.mxu1 %v3087_v13  ;;  %v3150_v13 = vld [vmem:[%s5866_s6 + $0x5] ss:$0 sm:$0xff] }
 0x2be   : > { %4287 = vmatpush3.msra.mxu0 %v3121_v23  ;;  %4257 = vmatprep.subr.mxu1 %v5870_v10 }
 0x2bf   : > { %4288 = vmatprep.subr.mxu0 %v5870_v10  ;;  %4258 = vmatpush3.msra.mxu1 %v3086_v33 }
 0x2c0   : > { %4289 = vmatpush3.msra.mxu0 %v3120_v39  ;;  %4259 = vmatprep.subr.mxu1 %v5870_v10 }
 0x2c1   : > { %4290 = vmatprep.subr.mxu0 %v5870_v10  ;;  %4260 = vmatpush3.msra.mxu1 %v3085_v2 }
 0x2c2   : > { %4291 = vmatpush3.msra.mxu0 %v3119_v14  ;;  %4261 = vmatprep.subr.mxu1 %v5870_v10  ;;  %v3160_v14 = vld [vmem:[%s5865_s5 + $0x50] sm:$0xff] }
 0x2c3   : > { %4292 = vmatprep.subr.mxu0 %v5870_v10  ;;  %4262 = vmatpush3.msra.mxu1 %v3084_v26  ;;  %v3159_v26 = vld [vmem:[%s5865_s5 + $0x48] sm:$0xff] }
 0x2c4   : > { %4293 = vmatpush3.msra.mxu0 %v3118_v4  ;;  %4263 = vmatprep.subr.mxu1 %v5870_v10  ;;  %v3158_v4 = vld [vmem:[%s5865_s5 + $0x40] sm:$0xff] }
 0x2c5   : > { %4294 = vmatprep.subr.mxu0 %v5870_v10  ;;  %4264 = vmatpush3.msra.mxu1 %v3083_v57  ;;  %v3156_v57 = vld [vmem:[%s5866_s6 + $0x6] ss:$0 sm:$0xff] }
 0x2c6   : > { %4265 = vmatprep.mubr.msk.f32.mxu1 %vm4368_vm2, %v5870_v10  ;;  %4295 = vmatpush3.msra.mxu0 %v3117_v17 }
 0x2c7   : > { %4266 = vmatmul.mubr.f32.vlgmr.msra.gmra.mxu1 %v1790_v43  ;;  %4296 = vmatprep.subr.mxu0 %v5870_v10 }
 0x2c8   : > { %4297 = vmatpush3.msra.mxu0 %v3116_v5  ;;  %4300 = vmatprep.mubr.msk.f32.mxu0 %vm4368_vm2, %v5870_v10 }
 0x2c9   : > { %4298 = vmatprep.subr.mxu0 %v5870_v10  ;;  %4303 = vmatprep.subr.mxu1 %v5870_v10 }
 0x2ca   : > { %4299 = vmatpush3.msra.mxu0 %v3115_v28  ;;  %4311 = vmatprep.mubr.msk.f32.mxu1 %vm4368_vm2, %v5870_v10 }
 0x2cb   : > { %4301 = vmatmul.mubr.f32.vlgmr.msra.gmra.mxu0 %v1792_v51  ;;  %4314 = vmatprep.subr.mxu0 %v5870_v10 }
 0x2cc   : > { %4322 = vmatprep.mubr.msk.f32.mxu0 %vm4368_vm2, %v5870_v10  ;;  %4304 = vmatpush3.msra.mxu1 %v2525_v48 }
 0x2cd   : > { %4305 = vmatprep.subr.mxu1 %v5870_v10  ;;  %4315 = vmatpush3.msra.mxu0 %v3155_v42 }
 0x2ce   : > { %4306 = vmatpush3.msra.mxu1 %v2524_v44  ;;  %4316 = vmatprep.subr.mxu0 %v5870_v10 }
 0x2cf   : > { %4307 = vmatprep.subr.mxu1 %v5870_v10  ;;  %4317 = vmatpush3.msra.mxu0 %v3154_v58 }
 0x2d0   : > { %4308 = vmatpush3.msra.mxu1 %v2523_v19  ;;  %4318 = vmatprep.subr.mxu0 %v5870_v10 }
 0x2d1   : > { %4309 = vmatprep.subr.mxu1 %v5870_v10  ;;  %4319 = vmatpush3.msra.mxu0 %v3153_v37 }
 0x2d2   : > { %4310 = vmatpush3.msra.mxu1 %v2522_v25  ;;  %4320 = vmatprep.subr.mxu0 %v5870_v10 }
 0x2d3   : > { %4325 = vmatprep.subr.mxu1 %v5870_v10  ;;  %4321 = vmatpush3.msra.mxu0 %v3152_v8 }
 0x323   : > { %v1893_v59 = vpop.f32.mrf.mxu1 }
 0x325   : > { %v4057_v53 = vpop.f32.mrf.mxu1 }
 0x327   : > { %v1997_v0 = vpop.f32.mrf.mxu0 }
 0x329   : > { %v4092_v18 = vpop.f32.mrf.mxu0 }
 0x343   : > { %v2101_v61 = vpop.f32.mrf.mxu1 }
 0x345   : > { %v4127_v20 = vpop.f32.mrf.mxu1 }
 0x348   : > { %v2205_v32 = vpop.f32.mrf.mxu0 }
 0x34a   : > { %v4162_v22 = vpop.f32.mrf.mxu0 }
 0x365   : > { %v2275_v7 = vpop.f32.mrf.mxu1 }
 0x366   : > { %v2276_v11 = vadd.f32 %v2275_v7, %v1893_v59  ;;  %v2776_v7 = vld [vmem:[%s289_s15] sm:$0xff] }
 0x367   : > { %v4197_v50 = vpop.f32.mrf.mxu1 }
 0x368   : > { %v2783_v50 = vmul.f32 -0.5, %v2776_v7 }
 0x36a   : > { %v2345_v36 = vpop.f32.mrf.mxu0 }
 0x36b   : > { %v2346_v56 = vadd.f32 %v2345_v36, %v1997_v0 }
 0x36c   : > { %v4232_v21 = vpop.f32.mrf.mxu0 }
 0x36d   : > { %v2489_v24 = vadd.f32 %v2346_v56, %v2276_v11 }
 0x387   : > { %v2415_v3 = vpop.f32.mrf.mxu1 }
 0x388   : > { %v2416_v38 = vadd.f32 %v2415_v3, %v2101_v61  ;;  %v2784_v3 = vmul.f32 %v2783_v50, %v2776_v7 }
 0x389   : > { %v4267_v35 = vpop.f32.mrf.mxu1 }
 0x38b   : > { %v2485_v12 = vpop.f32.mrf.mxu0 }
 0x38c   : > { %v2486_v31 = vadd.f32 %v2485_v12, %v2205_v32 }
 0x38d   : > { %v4302_v15 = vpop.f32.mrf.mxu0 }
 0x38e   : > { %v2490_v49 = vadd.f32 %v2486_v31, %v2416_v38 }
 0x390   : > { %v2491_v63 = vadd.f32 %v2490_v49, %v2489_v24 }
 0x392   : > { %v2496_v27 = vadd.f32 %v3147_v46, %v2491_v63 }
 0x394   : > { %v2498_v54 = vsel %vm2497_vm3, %v2496_v27, 0.0 }
 0x395   : > { %2499 = vadd.xlane.f32.xlu0 %v2498_v54 }
 0x41e   : > { %v2500_v41 = vpop.xlane.xlu0 %2499 }
 0x41f   : > { %v2502_v40 = vmul.f32 0.03125, %v2500_v41 }
 0x421   : > { %v2503_v16 = vsub.f32 %v2496_v27, %v2502_v40 }
 0x423   : > { %v2504_v55 = vmul.f32 %v2503_v16, %v2503_v16 }
 0x425   : > { %v2505_v62 = vsel %vm2497_vm3, %v2504_v55, 0.0 }
 0x426   : > { %2506 = vadd.xlane.f32.xlu0 %v2505_v62 }
 0x4af   : > { %v2507_v52 = vpop.xlane.xlu0 %2506 }
 0x4b0   : > { %v2508_v47 = vmul.f32 0.03125, %v2507_v52 }
 0x4b2   : > { %v2509_v1 = vadd.f32 1e-05, %v2508_v47 }
 0x4b4   : > { %4349 = vrsqrt.f32 %v2509_v1 }
 0x4c1   : > { %v4350_v34 = vpop.eup %4349 }
 0x4c2   : > { %v2511_v6 = vmul.f32 %v4350_v34, %v2503_v16 }
 0x4c4   : > { %v2516_v30 = vmul.f32 %v3148_v45, %v2511_v6 }
 0x4c6   : > { %v2521_v9 = vadd.f32 %v3149_v29, %v2516_v30 }
 0x4c8   : > { %4312 = vmatmul.mubr.msk.f32.vlgmr.msra.gmra.mxu1 %vm2497_vm3, %v2521_v9 }
 0x4c9   : > { %4333 = vmatprep.mubr.msk.f32.mxu1 %vm4368_vm2, %v5870_v10  ;;  %4326 = vmatpush3.msra.mxu1 %v3161_v60 }
 0x4ca   : > { %4327 = vmatprep.subr.mxu1 %v5870_v10 }
 0x4cb   : > { %4328 = vmatpush3.msra.mxu1 %v3160_v14 }
 0x4cc   : > { %4329 = vmatprep.subr.mxu1 %v5870_v10 }
 0x4cd   : > { %4330 = vmatpush3.msra.mxu1 %v3159_v26 }
 0x4ce   : > { %4331 = vmatprep.subr.mxu1 %v5870_v10  ;;  %v3163_v10 = vld [vmem:[%s5866_s6 + $0x7] ss:$0 sm:$0xff] }
 0x4cf   : > { %4332 = vmatpush3.msra.mxu1 %v3158_v4 }
 0x588   : > { %v2599_v23 = vpop.f32.mrf.mxu1 }
 0x589   : > { %v2600_v33 = vadd.f32 %v3150_v13, %v2599_v23 }
 0x58a   : > { %v4313_v39 = vpop.f32.mrf.mxu1 }
 0x58b   : > { %v2603_v2 = vmax.f32 %v2600_v33, 0.0 }
 0x58d   : > { %4323 = vmatmul.mubr.msk.f32.vlgmr.msra.gmra.mxu0 %vm2497_vm3, %v2603_v2 }
 0x64d   : > { %v2682_v17 = vpop.f32.mrf.mxu0 }
 0x64e   : > { %v2683_v43 = vadd.f32 %v3156_v57, %v2682_v17 }
 0x64f   : > { %v4324_v5 = vpop.f32.mrf.mxu0 }
 0x650   : > { %v2686_v28 = vmax.f32 %v2683_v43, 0.0 }
 0x652   : > { %4334 = vmatmul.mubr.msk.f32.vlgmr.msra.gmra.mxu1 %vm2497_vm3, %v2686_v28 }
 0x712   : > { %v2761_v51 = vpop.f32.mrf.mxu1 }
 0x713   : > { %v2769_v59 = vadd.f32 %v3163_v10, %v2761_v51 }
 0x714   : > { %v4335_v53 = vpop.f32.mrf.mxu1 }
 0x715   : > { %4351 = vtanh.f32 %v2769_v59 }
 0x722   : > { %v4352_v0 = vpop.eup %4351 }
 0x723   : > { %v2771_v18 = vadd.f32 1.0, %v4352_v0 }
 0x725   : > { %v2772_v61 = vmul.f32 6.0, %v2771_v18 }
 0x727   : > { %v2773_v20 = vadd.f32 -10.0, %v2772_v61 }
 0x729   : > { %v2774_v32 = vmul.f32 1.442695, %v2773_v20 }
 0x72b   : > { %4353 = vpow2.f32 %v2774_v32 }
 0x738   : > { %v4354_v22 = vpop.eup %4353 }
 0x739   : > { %2778 = vrot.lane.b32.xlu1 %v4354_v22, %s4369_s12 }
 0x73d   : > { %2786 = vrot.lane.b32.xlu1 %v2773_v20, %s4369_s12 }
 0x7ab   : > { %v2779_v36 = vpop.permute.xlu1 %2778 }
 0x7ac   : > { %v2781_v21 = vmul.f32 %v2779_v36, %v2776_v7 }
 0x7ae   : > { %v2782_v35 = vadd.f32 %v2781_v21, %v2769_v59 }
 0x7af   : > { %v2787_v56 = vpop.permute.xlu1 %2786 }
 0x7b0   : > { %4355 = vtanh.f32 %v2782_v35  ;;  %v2789_v12 = vsub.f32 %v2784_v3, %v2787_v56 }
 0x7b2   : > { %v2791_v11 = vsel %vm2790_vm4, %v2789_v12, 0.0 }
 0x7b3   : > { %2792 = vadd.xlane.f32.xlu0 %v2791_v11 }
 0x7bd   : > { %v4356_v38 = vpop.eup %4355 }
 0x7be   : > { %v2796_v31 = vmul.f32 %v4356_v38, %v4356_v38 }
 0x7c0   : > { %v2797_v15 = vsub.f32 1.0, %v2796_v31 }
 0x7c2   : > { %v2798_v24 = vmax.f32 %v2797_v15, 0.0 }
 0x7c4   : > { %v2799_v49 = vadd.f32 1e-06, %v2798_v24 }
 0x7c6   : > { %4357 = vlog2.f32 %v2799_v49 }
 0x7c9   : > { %2807 = vrot.lane.b32.xlu0 %v4356_v38, %s4370_s16 }
 0x7cd   : > { %2810 = vrot.lane.b32.xlu0 %v2773_v20, %s4370_s16 }
 0x7d3   : > { %v4358_v46 = vpop.eup %4357 }
 0x7d4   : > { %v2801_v63 = vmul.f32 0.6931472, %v4358_v46 }
 0x7d6   : > { %v2802_v27 = vsel %vm2790_vm4, %v2801_v63, 0.0 }
 0x7d7   : > { %2803 = vadd.xlane.f32.xlu1 %v2802_v27 }
 0x83c   : > { %v2793_v54 = vpop.xlane.xlu0 %2792 }
 0x83d   : > { %v3164_v40 = vadd.f32 -3.675754, %v2793_v54 }
 0x840   : > { %v2808_v41 = vpop.permute.xlu0 %2807 }
 0x841   : > { %v2813_v62 = vsel %vm2790_vm4, %v4352_v0, %v2808_v41 }
 0x844   : > { %v2811_v16 = vpop.permute.xlu0 %2810 }
 0x845   : > { %v2815_v44 = vsel %vm2814_vm5, %v2813_v62, %v2811_v16 }
 0x860   : > { %v2804_v55 = vpop.xlane.xlu1 %2803 }
 0x861   : > { %v2805_v48 = vsub.f32 %v3164_v40, %v2804_v55 }
 0x863   : > { %v2817_v19 = vsel %vm2816_vm6, %v2815_v44, %v2805_v48 }
 0x864   : > { %v2819_v25 = vsel %vm2818_vm7, %v2817_v19, 0.0 }
 0x865   : > { %2820 = vst [vmem:[%s293_s19] sm:$0xff] %v2819_v25 }
 0x866 PF: > { %s17_s24 = sadd.s32 1, %s4365_s24  }
 0x867   : > { %p14_p4 = scmp.ge.s32.totalorder %s17_s24, 4  }
 0x869   :  { %16 = sbr.rel (!%p14_p4) target bundleno = 1 (0x1), region = 98 }

</bundles_post_ra>
